<compile_context>
chip_gen: v5e
topology: v5e:2x2
jax: 0.10.0
libtpu: 0.0.40
codegen_flags: <defaults>
</compile_context>

<pallas_src>
import jax
import jax.numpy as jnp
from jax.experimental import pallas as pl
from jax.experimental.pallas import tpu as pltpu

STATE_SIZE = 32
ACTION_SIZE = 8
FC1_UNITS = 400
FC2_UNITS = 300
BN_EPS = 1e-5


def _twin_critic_head_kernel(state_ref, action_ref,
                             w1s_ref, w1a_ref, g_ref, be_ref,
                             w2_ref, b2_ref, w3_ref, b3_ref,
                             q_ref):
    """One grid step = one critic head. All per-head refs carry a leading block dim of 1."""
    s = state_ref[...].astype(jnp.bfloat16)     # (B, S)
    a = action_ref[...].astype(jnp.bfloat16)    # (B, A)

    # ---- fc1, split over (state, action) -- equivalent to concat(sa) @ w1.
    # Bias omitted: training-mode BatchNorm's mean subtraction cancels it exactly.
    h1 = (jnp.dot(s, w1s_ref[0], preferred_element_type=jnp.float32) +
          jnp.dot(a, w1a_ref[0], preferred_element_type=jnp.float32))       # (B, FC1) f32

    # ---- BatchNorm1d, training mode (biased batch stats): two-moment + fused affine.
    mean = jnp.mean(h1, axis=0, keepdims=True)                              # (1, FC1)
    mean_sq = jnp.mean(h1 * h1, axis=0, keepdims=True)                      # (1, FC1)
    var = jnp.maximum(mean_sq - mean * mean, 0.0)                           # guard cancellation
    scale = g_ref[0] * jax.lax.rsqrt(var + BN_EPS)                          # (1, FC1)
    shift = be_ref[0] - mean * scale                                        # (1, FC1)
    h1 = jnp.maximum(h1 * scale + shift, 0.0)                               # fused BN affine + ReLU

    # ---- fc2 + ReLU (bf16 into the MXU, f32 accumulate).
    h2 = jnp.dot(h1.astype(jnp.bfloat16), w2_ref[0],
                 preferred_element_type=jnp.float32)                        # (B, FC2)
    h2 = jnp.maximum(h2 + b2_ref[0], 0.0)

    # ---- fc3 -> scalar Q: VPU multiply + lane-sum (avoid an N=1 MXU pass).
    q = jnp.sum(h2 * w3_ref[0], axis=-1, keepdims=True) + b3_ref[0]         # (B, 1)
    q_ref[0] = q.astype(q_ref.dtype)


def twin_critic_forward(state, action, params):
    """state: (B, STATE_SIZE) f32, action: (B, ACTION_SIZE) f32 -> (q1, q2), each (B, 1) f32.

    The batch is processed in one VMEM-resident block per head (BatchNorm needs
    full-batch statistics).  For throughput, call with a large B to amortize the
    per-call weight DMA and launch overhead; raise vmem_limit_bytes for very large B
    (v7x has 64 MiB VMEM/TC, v5e defaults to a 16 MiB scoped limit).
    """
    B = state.shape[0]

    args = (
        state, action,
        params["w1_s"], params["w1_a"], params["gamma"], params["beta"],
        params["w2"], params["b2"], params["w3"], params["b3"],
    )

    in_specs = [
        # state / action: constant block across the head grid (fetched once).
        pl.BlockSpec((B, STATE_SIZE), lambda h: (0, 0)),
        pl.BlockSpec((B, ACTION_SIZE), lambda h: (0, 0)),
        # per-head parameters: leading axis selects the head.
        pl.BlockSpec((1, STATE_SIZE, FC1_UNITS), lambda h: (h, 0, 0)),
        pl.BlockSpec((1, ACTION_SIZE, FC1_UNITS), lambda h: (h, 0, 0)),
        pl.BlockSpec((1, 1, FC1_UNITS), lambda h: (h, 0, 0)),
        pl.BlockSpec((1, 1, FC1_UNITS), lambda h: (h, 0, 0)),
        pl.BlockSpec((1, FC1_UNITS, FC2_UNITS), lambda h: (h, 0, 0)),
        pl.BlockSpec((1, 1, FC2_UNITS), lambda h: (h, 0, 0)),
        pl.BlockSpec((1, 1, FC2_UNITS), lambda h: (h, 0, 0)),
        pl.BlockSpec((1, 1, 1), lambda h: (h, 0, 0)),
    ]
    out_spec = pl.BlockSpec((1, B, 1), lambda h: (h, 0, 0))

    flops = 2 * 2 * B * ((STATE_SIZE + ACTION_SIZE) * FC1_UNITS
                         + FC1_UNITS * FC2_UNITS + FC2_UNITS)
    bytes_accessed = sum(int(a.size) * a.dtype.itemsize for a in args) + 2 * B * 4
    cost = pl.CostEstimate(flops=flops,
                           transcendentals=2 * FC1_UNITS,   # one rsqrt per BN feature per head
                           bytes_accessed=bytes_accessed)

    q = pl.pallas_call(
        _twin_critic_head_kernel,
        grid=(2,),                                   # one grid step per critic head
        out_shape=jax.ShapeDtypeStruct((2, B, 1), jnp.float32),
        in_specs=in_specs,
        out_specs=out_spec,
        compiler_params=pltpu.CompilerParams(
            dimension_semantics=("parallel",),        # heads shard across TCs on v7x
            vmem_limit_bytes=32 << 20),
        cost_estimate=cost,
    )(*args)
    return q[0], q[1]


def init_params(key):
    """Deterministic init mirroring TwinCritic.reset_parameters.

    hidden_init uses weight.size()[0] == out_features (a quirk of the original code),
    so lim = 1/sqrt(fc_units) for fc1/fc2 weights; fc3 weights are U(-3e-3, 3e-3).
    Biases keep PyTorch's default U(-1/sqrt(in_features), ...).  Weights are stored
    pre-transposed as (in, out) with a leading head axis of 2; w1 (pre-split into
    state/action parts) and w2 are bf16 (DMA-dominant), everything else f32.
    fc1 biases are omitted (cancelled exactly by training-mode BatchNorm).
    """
    in_dim = STATE_SIZE + ACTION_SIZE
    lim1 = 1.0 / (FC1_UNITS ** 0.5)
    lim2 = 1.0 / (FC2_UNITS ** 0.5)
    blim2 = 1.0 / (FC1_UNITS ** 0.5)
    blim3 = 1.0 / (FC2_UNITS ** 0.5)
    ks = jax.random.split(key, 5)

    w1 = jax.random.uniform(ks[0], (2, in_dim, FC1_UNITS), jnp.float32, -lim1, lim1)
    w2 = jax.random.uniform(ks[1], (2, FC1_UNITS, FC2_UNITS), jnp.float32, -lim2, lim2)
    w3 = jax.random.uniform(ks[2], (2, 1, FC2_UNITS), jnp.float32, -3e-3, 3e-3)
    b2 = jax.random.uniform(ks[3], (2, 1, FC2_UNITS), jnp.float32, -blim2, blim2)
    b3 = jax.random.uniform(ks[4], (2, 1, 1), jnp.float32, -blim3, blim3)

    return {
        "w1_s": w1[:, :STATE_SIZE, :].astype(jnp.bfloat16),
        "w1_a": w1[:, STATE_SIZE:, :].astype(jnp.bfloat16),
        "gamma": jnp.ones((2, 1, FC1_UNITS), jnp.float32),   # BatchNorm1d weight
        "beta": jnp.zeros((2, 1, FC1_UNITS), jnp.float32),   # BatchNorm1d bias
        "w2": w2.astype(jnp.bfloat16),
        "b2": b2,
        "w3": w3,
        "b3": b3,
    }


def reference_forward(state, action, params):
    """Pure-JAX reference mirroring the kernel's numerics (bf16 weights, f32 accumulate)."""
    s = state.astype(jnp.bfloat16)
    a = action.astype(jnp.bfloat16)

    def head(h):
        h1 = (jnp.dot(s, params["w1_s"][h], preferred_element_type=jnp.float32) +
              jnp.dot(a, params["w1_a"][h], preferred_element_type=jnp.float32))
        mean = jnp.mean(h1, axis=0, keepdims=True)
        mean_sq = jnp.mean(h1 * h1, axis=0, keepdims=True)
        var = jnp.maximum(mean_sq - mean * mean, 0.0)
        scale = params["gamma"][h] * jax.lax.rsqrt(var + BN_EPS)
        shift = params["beta"][h] - mean * scale
        h1 = jnp.maximum(h1 * scale + shift, 0.0)
        h2 = jnp.dot(h1.astype(jnp.bfloat16), params["w2"][h],
                     preferred_element_type=jnp.float32)
        h2 = jnp.maximum(h2 + params["b2"][h], 0.0)
        return jnp.sum(h2 * params["w3"][h], axis=-1, keepdims=True) + params["b3"][h]

    return head(0), head(1)


if __name__ == "__main__":
    key = jax.random.PRNGKey(0)
    pkey, skey, akey = jax.random.split(key, 3)
    params = init_params(pkey)

    batch = 8
    state = jax.random.normal(skey, (batch, STATE_SIZE), jnp.float32)
    action = jax.random.normal(akey, (batch, ACTION_SIZE), jnp.float32)

    q1, q2 = twin_critic_forward(state, action, params)
    q1 = jax.block_until_ready(q1)
    q2 = jax.block_until_ready(q2)

    r1, r2 = reference_forward(state, action, params)
    assert q1.shape == (batch, 1) and q2.shape == (batch, 1)
    assert jnp.allclose(q1, r1, atol=5e-3, rtol=5e-3), "q1 mismatch vs reference"
    assert jnp.allclose(q2, r2, atol=5e-3, rtol=5e-3), "q2 mismatch vs reference"

    print("KERNEL_OK")
</pallas_src>

<mosaic_0001>
module attributes {stable_mosaic.version = 11 : i64} {
  func.func @_twin_critic_head_kernel(%arg0: i32, %arg1: memref<8x32xf32, #tpu.memory_space<vmem>>, %arg2: memref<8x8xf32, #tpu.memory_space<vmem>>, %arg3: memref<1x32x400xbf16, #tpu.memory_space<vmem>>, %arg4: memref<1x8x400xbf16, #tpu.memory_space<vmem>>, %arg5: memref<1x1x400xf32, #tpu.memory_space<vmem>>, %arg6: memref<1x1x400xf32, #tpu.memory_space<vmem>>, %arg7: memref<1x400x300xbf16, #tpu.memory_space<vmem>>, %arg8: memref<1x1x300xf32, #tpu.memory_space<vmem>>, %arg9: memref<1x1x300xf32, #tpu.memory_space<vmem>>, %arg10: memref<1x1x1xf32, #tpu.memory_space<vmem>>, %arg11: memref<1x8x1xf32, #tpu.memory_space<vmem>>) attributes {dimension_semantics = [#tpu.dimension_semantics<parallel>], iteration_bounds = array<i64: 2>, scalar_prefetch = 0 : i64, scratch_operands = 0 : i64, tpu.core_type = #tpu.core_type<tc>, window_params = [{pipeline_mode = #tpu.pipeline_mode<synchronous>, transform_indices = @transform_0, window_bounds = array<i64: 8, 32>}, {pipeline_mode = #tpu.pipeline_mode<synchronous>, transform_indices = @transform_1, window_bounds = array<i64: 8, 8>}, {transform_indices = @transform_2, window_bounds = array<i64: 1, 32, 400>}, {transform_indices = @transform_3, window_bounds = array<i64: 1, 8, 400>}, {transform_indices = @transform_4, window_bounds = array<i64: 1, 1, 400>}, {transform_indices = @transform_5, window_bounds = array<i64: 1, 1, 400>}, {transform_indices = @transform_6, window_bounds = array<i64: 1, 400, 300>}, {transform_indices = @transform_7, window_bounds = array<i64: 1, 1, 300>}, {transform_indices = @transform_8, window_bounds = array<i64: 1, 1, 300>}, {transform_indices = @transform_9, window_bounds = array<i64: 1, 1, 1>}, {transform_indices = @transform_10, window_bounds = array<i64: 1, 8, 1>}]} {
    %c0 = arith.constant 0 : index
    %c0_0 = arith.constant 0 : index
    %0 = vector.load %arg1[%c0, %c0_0] : memref<8x32xf32, #tpu.memory_space<vmem>>, vector<8x32xf32>
    %1 = arith.truncf %0 : vector<8x32xf32> to vector<8x32xbf16>
    %c0_1 = arith.constant 0 : index
    %c0_2 = arith.constant 0 : index
    %2 = vector.load %arg2[%c0_1, %c0_2] : memref<8x8xf32, #tpu.memory_space<vmem>>, vector<8x8xf32>
    %3 = arith.truncf %2 : vector<8x8xf32> to vector<8x8xbf16>
    %c0_3 = arith.constant 0 : index
    %c0_4 = arith.constant 0 : index
    %c0_5 = arith.constant 0 : index
    %4 = vector.load %arg3[%c0_3, %c0_4, %c0_5] : memref<1x32x400xbf16, #tpu.memory_space<vmem>>, vector<1x32x400xbf16>
    %5 = vector.shape_cast %4 : vector<1x32x400xbf16> to vector<32x400xbf16>
    %cst = arith.constant dense<0.000000e+00> : vector<8x400xf32>
    %6 = tpu.matmul %1, %5, %cst {dimension_numbers = #tpu.dot_dimension_numbers<[1], [0], [0], [1], [0, 0, 1, 1], [], []>} : vector<8x32xbf16>, vector<32x400xbf16>, vector<8x400xf32> -> vector<8x400xf32>
    %c0_6 = arith.constant 0 : index
    %c0_7 = arith.constant 0 : index
    %c0_8 = arith.constant 0 : index
    %7 = vector.load %arg4[%c0_6, %c0_7, %c0_8] : memref<1x8x400xbf16, #tpu.memory_space<vmem>>, vector<1x8x400xbf16>
    %8 = vector.shape_cast %7 : vector<1x8x400xbf16> to vector<8x400xbf16>
    %cst_9 = arith.constant dense<0.000000e+00> : vector<8x400xf32>
    %9 = tpu.matmul %3, %8, %cst_9 {dimension_numbers = #tpu.dot_dimension_numbers<[1], [0], [0], [1], [0, 0, 1, 1], [], []>} : vector<8x8xbf16>, vector<8x400xbf16>, vector<8x400xf32> -> vector<8x400xf32>
    %10 = arith.addf %6, %9 : vector<8x400xf32>
    %cst_10 = arith.constant dense<0.000000e+00> : vector<400xf32>
    %11 = vector.multi_reduction <add>, %10, %cst_10 [0] : vector<8x400xf32> to vector<400xf32>
    %12 = vector.shape_cast %11 : vector<400xf32> to vector<1x400xf32>
    %cst_11 = arith.constant 8.000000e+00 : f32
    %13 = vector.broadcast %cst_11 : f32 to vector<1x400xf32>
    %14 = arith.divf %12, %13 : vector<1x400xf32>
    %15 = arith.mulf %10, %10 : vector<8x400xf32>
    %cst_12 = arith.constant dense<0.000000e+00> : vector<400xf32>
    %16 = vector.multi_reduction <add>, %15, %cst_12 [0] : vector<8x400xf32> to vector<400xf32>
    %17 = vector.shape_cast %16 : vector<400xf32> to vector<1x400xf32>
    %cst_13 = arith.constant 8.000000e+00 : f32
    %18 = vector.broadcast %cst_13 : f32 to vector<1x400xf32>
    %19 = arith.divf %17, %18 : vector<1x400xf32>
    %20 = arith.mulf %14, %14 : vector<1x400xf32>
    %21 = arith.subf %19, %20 : vector<1x400xf32>
    %cst_14 = arith.constant 0.000000e+00 : f32
    %22 = vector.broadcast %cst_14 : f32 to vector<1x400xf32>
    %23 = arith.maximumf %21, %22 : vector<1x400xf32>
    %c0_15 = arith.constant 0 : index
    %c0_16 = arith.constant 0 : index
    %c0_17 = arith.constant 0 : index
    %24 = vector.load %arg5[%c0_15, %c0_16, %c0_17] : memref<1x1x400xf32, #tpu.memory_space<vmem>>, vector<1x1x400xf32>
    %25 = vector.shape_cast %24 : vector<1x1x400xf32> to vector<1x400xf32>
    %cst_18 = arith.constant 9.99999974E-6 : f32
    %26 = vector.broadcast %cst_18 : f32 to vector<1x400xf32>
    %27 = arith.addf %23, %26 : vector<1x400xf32>
    %28 = math.rsqrt %27 : vector<1x400xf32>
    %29 = arith.mulf %25, %28 : vector<1x400xf32>
    %c0_19 = arith.constant 0 : index
    %c0_20 = arith.constant 0 : index
    %c0_21 = arith.constant 0 : index
    %30 = vector.load %arg6[%c0_19, %c0_20, %c0_21] : memref<1x1x400xf32, #tpu.memory_space<vmem>>, vector<1x1x400xf32>
    %31 = vector.shape_cast %30 : vector<1x1x400xf32> to vector<1x400xf32>
    %32 = arith.mulf %14, %29 : vector<1x400xf32>
    %33 = arith.subf %31, %32 : vector<1x400xf32>
    %34 = vector.broadcast %29 : vector<1x400xf32> to vector<8x400xf32>
    %35 = arith.mulf %10, %34 : vector<8x400xf32>
    %36 = vector.broadcast %33 : vector<1x400xf32> to vector<8x400xf32>
    %37 = arith.addf %35, %36 : vector<8x400xf32>
    %cst_22 = arith.constant 0.000000e+00 : f32
    %38 = vector.broadcast %cst_22 : f32 to vector<8x400xf32>
    %39 = arith.maximumf %37, %38 : vector<8x400xf32>
    %40 = arith.truncf %39 : vector<8x400xf32> to vector<8x400xbf16>
    %c0_23 = arith.constant 0 : index
    %c0_24 = arith.constant 0 : index
    %c0_25 = arith.constant 0 : index
    %41 = vector.load %arg7[%c0_23, %c0_24, %c0_25] : memref<1x400x300xbf16, #tpu.memory_space<vmem>>, vector<1x400x300xbf16>
    %42 = vector.shape_cast %41 : vector<1x400x300xbf16> to vector<400x300xbf16>
    %cst_26 = arith.constant dense<0.000000e+00> : vector<8x300xf32>
    %43 = tpu.matmul %40, %42, %cst_26 {dimension_numbers = #tpu.dot_dimension_numbers<[1], [0], [0], [1], [0, 0, 1, 1], [], []>} : vector<8x400xbf16>, vector<400x300xbf16>, vector<8x300xf32> -> vector<8x300xf32>
    %c0_27 = arith.constant 0 : index
    %c0_28 = arith.constant 0 : index
    %c0_29 = arith.constant 0 : index
    %44 = vector.load %arg8[%c0_27, %c0_28, %c0_29] : memref<1x1x300xf32, #tpu.memory_space<vmem>>, vector<1x1x300xf32>
    %45 = vector.shape_cast %44 : vector<1x1x300xf32> to vector<1x300xf32>
    %46 = vector.broadcast %45 : vector<1x300xf32> to vector<8x300xf32>
    %47 = arith.addf %43, %46 : vector<8x300xf32>
    %cst_30 = arith.constant 0.000000e+00 : f32
    %48 = vector.broadcast %cst_30 : f32 to vector<8x300xf32>
    %49 = arith.maximumf %47, %48 : vector<8x300xf32>
    %c0_31 = arith.constant 0 : index
    %c0_32 = arith.constant 0 : index
    %c0_33 = arith.constant 0 : index
    %50 = vector.load %arg9[%c0_31, %c0_32, %c0_33] : memref<1x1x300xf32, #tpu.memory_space<vmem>>, vector<1x1x300xf32>
    %51 = vector.shape_cast %50 : vector<1x1x300xf32> to vector<1x300xf32>
    %52 = vector.broadcast %51 : vector<1x300xf32> to vector<8x300xf32>
    %53 = arith.mulf %49, %52 : vector<8x300xf32>
    %cst_34 = arith.constant dense<0.000000e+00> : vector<8xf32>
    %54 = vector.multi_reduction <add>, %53, %cst_34 [1] : vector<8x300xf32> to vector<8xf32>
    %55 = vector.shape_cast %54 : vector<8xf32> to vector<8x1xf32>
    %c0_35 = arith.constant 0 : index
    %c0_36 = arith.constant 0 : index
    %c0_37 = arith.constant 0 : index
    %56 = vector.load %arg10[%c0_35, %c0_36, %c0_37] : memref<1x1x1xf32, #tpu.memory_space<vmem>>, vector<1x1x1xf32>
    %57 = vector.shape_cast %56 : vector<1x1x1xf32> to vector<1x1xf32>
    %58 = vector.broadcast %57 : vector<1x1xf32> to vector<8x1xf32>
    %59 = arith.addf %55, %58 : vector<8x1xf32>
    %c0_38 = arith.constant 0 : index
    %c0_39 = arith.constant 0 : index
    %c0_40 = arith.constant 0 : index
    %60 = vector.load %arg11[%c0_38, %c0_39, %c0_40] : memref<1x8x1xf32, #tpu.memory_space<vmem>>, vector<1x8x1xf32>
    %61 = vector.shape_cast %60 : vector<1x8x1xf32> to vector<8x1xf32>
    %62 = vector.shape_cast %59 : vector<8x1xf32> to vector<1x8x1xf32>
    tpu.vector_store %arg11[%c0_38, %c0_39, %c0_40], %62 {strides = array<i32>} : memref<1x8x1xf32, #tpu.memory_space<vmem>>, vector<1x8x1xf32>,
    return
  }
  func.func @transform_0(%arg0: i32) -> (i32, i32) {
    %c0_i32 = arith.constant 0 : i32
    %c0_i32_0 = arith.constant 0 : i32
    %c0_i32_1 = arith.constant 0 : i32
    return %c0_i32, %c0_i32_0 : i32, i32
  }
  func.func @transform_1(%arg0: i32) -> (i32, i32) {
    %c0_i32 = arith.constant 0 : i32
    %c0_i32_0 = arith.constant 0 : i32
    %c0_i32_1 = arith.constant 0 : i32
    return %c0_i32, %c0_i32_0 : i32, i32
  }
  func.func @transform_2(%arg0: i32) -> (i32, i32, i32) {
    %c0_i32 = arith.constant 0 : i32
    %c0_i32_0 = arith.constant 0 : i32
    %c0_i32_1 = arith.constant 0 : i32
    return %arg0, %c0_i32, %c0_i32_0 : i32, i32, i32
  }
  func.func @transform_3(%arg0: i32) -> (i32, i32, i32) {
    %c0_i32 = arith.constant 0 : i32
    %c0_i32_0 = arith.constant 0 : i32
    %c0_i32_1 = arith.constant 0 : i32
    return %arg0, %c0_i32, %c0_i32_0 : i32, i32, i32
  }
  func.func @transform_4(%arg0: i32) -> (i32, i32, i32) {
    %c0_i32 = arith.constant 0 : i32
    %c0_i32_0 = arith.constant 0 : i32
    %c0_i32_1 = arith.constant 0 : i32
    return %arg0, %c0_i32, %c0_i32_0 : i32, i32, i32
  }
  func.func @transform_5(%arg0: i32) -> (i32, i32, i32) {
    %c0_i32 = arith.constant 0 : i32
    %c0_i32_0 = arith.constant 0 : i32
    %c0_i32_1 = arith.constant 0 : i32
    return %arg0, %c0_i32, %c0_i32_0 : i32, i32, i32
  }
  func.func @transform_6(%arg0: i32) -> (i32, i32, i32) {
    %c0_i32 = arith.constant 0 : i32
    %c0_i32_0 = arith.constant 0 : i32
    %c0_i32_1 = arith.constant 0 : i32
    return %arg0, %c0_i32, %c0_i32_0 : i32, i32, i32
  }
  func.func @transform_7(%arg0: i32) -> (i32, i32, i32) {
    %c0_i32 = arith.constant 0 : i32
    %c0_i32_0 = arith.constant 0 : i32
    %c0_i32_1 = arith.constant 0 : i32
    return %arg0, %c0_i32, %c0_i32_0 : i32, i32, i32
  }
  func.func @transform_8(%arg0: i32) -> (i32, i32, i32) {
    %c0_i32 = arith.constant 0 : i32
    %c0_i32_0 = arith.constant 0 : i32
    %c0_i32_1 = arith.constant 0 : i32
    return %arg0, %c0_i32, %c0_i32_0 : i32, i32, i32
  }
  func.func @transform_9(%arg0: i32) -> (i32, i32, i32) {
    %c0_i32 = arith.constant 0 : i32
    %c0_i32_0 = arith.constant 0 : i32
    %c0_i32_1 = arith.constant 0 : i32
    return %arg0, %c0_i32, %c0_i32_0 : i32, i32, i32
  }
  func.func @transform_10(%arg0: i32) -> (i32, i32, i32) {
    %c0_i32 = arith.constant 0 : i32
    %c0_i32_0 = arith.constant 0 : i32
    %c0_i32_1 = arith.constant 0 : i32
    return %arg0, %c0_i32, %c0_i32_0 : i32, i32, i32
  }
}

</mosaic_0001>

<bundles_post_ra>
// kernel: tpu_custom_call.1
= control target key start
LH: loop header
LB: loop body
LE: loop exit
PB: predicated region body
PF: predicated region fallthrough
CT: control target
= control target key end

     0   :  { %s3399_s0 = inlined_call_operand.hbm [shape: f32[8,32], index: 0, kind: input, shape index: {}]   ;;  %s3400_s1 = inlined_call_operand.hbm [shape: f32[8,8], index: 1, kind: input, shape index: {}]   ;;  %s3401_s2 = inlined_call_operand.hbm [shape: bf16[2,32,400], index: 2, kind: input, shape index: {}]   ;;  %s3402_s3 = inlined_call_operand.hbm [shape: bf16[2,8,400], index: 3, kind: input, shape index: {}]   ;;  %s3403_s4 = inlined_call_operand.hbm [shape: f32[2,1,400], index: 4, kind: input, shape index: {}]   ;;  %s3404_s5 = inlined_call_operand.hbm [shape: f32[2,1,400], index: 5, kind: input, shape index: {}]   ;;  %s3405_s6 = inlined_call_operand.hbm [shape: bf16[2,400,300], index: 6, kind: input, shape index: {}]   ;;  %s3406_s7 = inlined_call_operand.vmem [shape: f32[2,1,300], index: 7, kind: input, shape index: {}]   ;;  %s3407_s8 = inlined_call_operand.hbm [shape: f32[2,1,300], index: 8, kind: input, shape index: {}]   ;;  %s3408_s9 = inlined_call_operand.vmem [shape: f32[2,1,1], index: 9, kind: input, shape index: {}]   ;;  %s3409_s10 = inlined_call_operand.vmem [shape: f32[2,8,1], index: 10, kind: output, shape index: {}]  }
   0x1   :  { %3414 = sst [smem:[#allocation18_spill]] %s3399_s0 }
   0x2   :  { %3415 = sst [smem:[#allocation19_spill]] %s3400_s1 }
   0x3   :  { %3416 = sst [smem:[#allocation20_spill]] %s3401_s2 }
   0x4   :  { %3417 = sst [smem:[#allocation21_spill]] %s3406_s7 }
   0x5   :  { %3418 = sst [smem:[#allocation22_spill]] %s3408_s9 }
   0x6   :  { %3419 = sst [smem:[#allocation23_spill]] %s3409_s10 }
   0x7   :  { %15 = vsyncpa [#allocation3], 0 }
   0x8   :  { %16 = vsyncpa [#allocation5], 0  ;;  %s2812_s13 = smov 0   ;;  %s2814_s14 = smov 0  }
   0x9   :  { %s2816_s15 = smov 0   ;;  %s2818_s16 = smov 0  }
   0xa LB: > { %3420 = sst [smem:[#allocation15_spill]] %s2744_s15  ;;  %s2831_s17 = sadd.s32 4294967295, %s2748_s16   ;;  %s2748_s16 = sphi %s2818_s16, %s3442_s16   ;;  %s2744_s15 = sphi %s2816_s15, %s3444_s15   ;;  %s2740_s14 = sphi %s2814_s14, %s3446_s14   ;;  %s2736_s13 = sphi %s2812_s13, %s3445_s13  }
   0xb   : > { %s2834_s18 = sadd.s32 1, %s2748_s16   ;;  %s71_s20 = sadd.s32 1, %s2744_s15 }
   0xc   : > { %3421 = sst [smem:[#allocation16_spill]] %s2834_s18  ;;  %s68_s19 = ssub.s32 %s2748_s16, %s2834_s18 }
   0xd   : > { %p69_p0 = scmp.eq.s32.totalorder %s68_s19, 0  ;;  %p78_p1 = scmp.ne.s32.totalorder %s2744_s15, %s2740_s14 }
   0xe   : > { %p79_p2 = scmp.eq.s32.totalorder %s2748_s16, 0  ;;  %p84_p3 = scmp.ne.s32.totalorder %s2740_s14, %s2736_s13 }
   0xf   : > { %s2844_s21 = scalar_select %p69_p0, %s2744_s15, %s71_s20  }
  0x10   : > { %p2846_p4 = por %p79_p2, %p78_p1  ;;  %p85_p5 = scmp.eq.s32.totalorder %s2831_s17, 0 }
  0x11   : > { %3422 = sst [smem:[#allocation17_spill]] %s2844_s21  ;;  %p1905_p6 = scmp.ge.s32.totalorder %s2748_s16, 1 }
  0x12   : > { %p303_p7 = scmp.lt.s32.totalorder %s2748_s16, 3  ;;  %p2855_p8 = por %p85_p5, %p84_p3 }
  0x13   : > { %s3426_s0 = sld [smem:[#allocation18_spill]]  ;;  %s2750_s28 = smov [#allocation2]  }
  0x14   : > { %p2859_p9 = pnand %p1905_p6, %p303_p7  ;;  %s317_s29 = sshll.u32 %s2750_s28, 4  ;;  %s318_s29 = int_to_ptr.vmem [resolvable:$true] %s317_s29 }
  0x15   : > { %p2413_p12 = scmp.lt.s32.totalorder %s2748_s16, 2  ;;  %s340_s11 = sand.u32 1, %s2748_s16  }
  0x16   : > { %p2385_p10 = pneg %p2859_p9  ;;  %s2877_s12 = sand.u32 1, %s2744_s15  }
  0x17   : > { %p2881_p13 = pnand %p2413_p12, %p2846_p4  ;;  %s1909_s19 = sshll.u32 %s2877_s12, 6 }
  0x18   : > { %p2870_p11 = pnand %p2385_p10, %p85_p5  ;;  %s2273_s20 = sshll.u32 %s2748_s16, 6 }
  0x19   : > { %s315_s27 = sshll.u32 %s3426_s0, 4  ;;  %s3429_s2 = sld [smem:[#allocation20_spill]]  ;;  %s316_s27 = int_to_ptr.hbm [resolvable:$true] %s315_s27 }
  0x1a   : > { %2388 = dma.hbm_to_vmem [thread:$0]  (!%p2870_p11), %s316_s27, 128, %s318_s29, [#allocation3]  }
  0x1b   : > { %s344_s21 = scalar_lea.vmem [#allocation6], %s1909_s19  ;;  %s2892_s22 = scalar_lea.sflag [#allocation3], %s340_s11 }
  0x1c   : > { %s352_s18 = sshll.u32 %s344_s21, 4  ;;  %p2896_p1 = pneg %p2881_p13  ;;  %s353_s18 = int_to_ptr.vmem [resolvable:$true] %s352_s18 }
  0x1f   : > { %s349_s28 = scalar_lea.hbm %s3429_s2, %s2273_s20  ;;  %s2503_s21 = scalar_lea.hbm %s3429_s2, 128 }
  0x20   : > { %s350_s0 = sshll.u32 %s349_s28, 4  ;;  %s351_s0 = int_to_ptr.hbm [resolvable:$true] %s350_s0 }
  0x21   : > { %s2496_s15 = sshra.s32 %s351_s0, 4  ;;  %s2497_s15 = int_to_ptr.hbm [resolvable:$true] %s2496_s15 }
  0x22   : > { %s2498_s10 = scalar_lea.hbm %s2497_s15, 64  ;;  %p2504_p4 = scmp.lt.s32.totalorder %s2497_s15, %s3429_s2 }
  0x23   : > { %p2499_p0 = scmp.ne.s32.totalorder %s2497_s15, %s2498_s10  ;;  %p2505_p6 = scmp.lt.s32.totalorder %s2503_s21, %s2498_s10 }
  0x25   : > { %p2501_p2 = pnand %p2896_p1, %p2499_p0  ;;  %p2506_p7 = por %p2505_p6, %p2504_p4 }
  0x27   : > { %p2502_p3 = pneg %p2501_p2 }
  0x29   : > { %p2507_p10 = pnand %p2506_p7, %p2502_p3 }
  0x2b   : > { %2510 = shalt.err (!%p2507_p10)
}
  0x2c   : > { %s2751_s25 = smov 256   ;;  %s2752_s26 = smov 16  }
  0x2d   : > { %2395 = dma.hbm_to_vmem [thread:$0]  (!%p2881_p13), %s351_s0, 1024, %s353_s18, %s2892_s22, %s2751_s25, %s2751_s25, %s2752_s26  }
  0x2e   : > { %s1912_s28 = sshll.u32 %s2877_s12, 4  ;;  %s2274_s29 = sshll.u32 %s2748_s16, 4 }
  0x2f   : > { %s371_s20 = scalar_lea.hbm %s3402_s3, %s2274_s29  ;;  %s366_s10 = scalar_lea.vmem [#allocation7], %s1912_s28 }
  0x30   : > { %s373_s15 = sshll.u32 %s371_s20, 4  ;;  %s375_s21 = sshll.u32 %s366_s10, 4  ;;  %s374_s15 = int_to_ptr.hbm [resolvable:$true] %s373_s15  ;;  %s376_s21 = int_to_ptr.vmem [resolvable:$true] %s375_s21 }
  0x31   : > { %s2526_s11 = sshra.s32 %s374_s15, 4  ;;  %s2533_s18 = scalar_lea.hbm %s3402_s3, 32  ;;  %s2527_s11 = int_to_ptr.hbm [resolvable:$true] %s2526_s11 }
  0x32   : > { %s2528_s2 = scalar_lea.hbm %s2527_s11, 16  ;;  %p2534_p3 = scmp.lt.s32.totalorder %s2527_s11, %s3402_s3 }
  0x33   : > { %p2529_p12 = scmp.ne.s32.totalorder %s2527_s11, %s2528_s2  ;;  %p2535_p4 = scmp.lt.s32.totalorder %s2533_s18, %s2528_s2 }
  0x35   : > { %p2531_p0 = pnand %p2529_p12, %p2896_p1  ;;  %p2536_p6 = por %p2535_p4, %p2534_p3 }
  0x37   : > { %p2532_p2 = pneg %p2531_p0 }
  0x39   : > { %p2537_p7 = pnand %p2536_p6, %p2532_p2 }
  0x3b   : > { %2540 = shalt.err (!%p2537_p7)
}
  0x3c   : > { %2398 = dma.hbm_to_vmem [thread:$0]  (!%p2881_p13), %s374_s15, 256, %s376_s21, %s2892_s22  }
  0x3d   : > { %s1915_s7 = sshll.u32 %s2877_s12, 2  ;;  %s1916_s28 = sshll.u32 %s2748_s16, 2 }
  0x3e   : > { %s390_s19 = scalar_lea.hbm %s3403_s4, %s1916_s28  ;;  %s386_s10 = scalar_lea.vmem [#allocation8], %s1915_s7 }
  0x3f   : > { %s392_s20 = sshll.u32 %s390_s19, 4  ;;  %s394_s11 = sshll.u32 %s386_s10, 4  ;;  %s393_s20 = int_to_ptr.hbm [resolvable:$true] %s392_s20  ;;  %s395_s11 = int_to_ptr.vmem [resolvable:$true] %s394_s11 }
  0x40   : > { %s2556_s2 = sshra.s32 %s393_s20, 4  ;;  %s2563_s21 = scalar_lea.hbm %s3403_s4, 8  ;;  %s2557_s2 = int_to_ptr.hbm [resolvable:$true] %s2556_s2 }
  0x41   : > { %s2558_s0 = scalar_lea.hbm %s2557_s2, 4  ;;  %p2564_p2 = scmp.lt.s32.totalorder %s2557_s2, %s3403_s4 }
  0x42   : > { %p2559_p10 = scmp.ne.s32.totalorder %s2557_s2, %s2558_s0  ;;  %p2565_p3 = scmp.lt.s32.totalorder %s2563_s21, %s2558_s0 }
  0x44   : > { %p2561_p12 = pnand %p2559_p10, %p2896_p1  ;;  %p2566_p4 = por %p2565_p3, %p2564_p2 }
  0x46   : > { %p2562_p0 = pneg %p2561_p12 }
  0x48   : > { %p2567_p6 = pnand %p2566_p4, %p2562_p0 }
  0x4a   : > { %2570 = shalt.err (!%p2567_p6)
}
  0x4b   : > { %2401 = dma.hbm_to_vmem [thread:$0]  (!%p2881_p13), %s393_s20, 64, %s395_s11, %s2892_s22  }
  0x4c   : > { %s409_s19 = scalar_lea.hbm %s3404_s5, %s1916_s28  ;;  %s405_s18 = scalar_lea.vmem [#allocation9], %s1915_s7 }
  0x4d   : > { %s411_s10 = sshll.u32 %s409_s19, 4  ;;  %s413_s15 = sshll.u32 %s405_s18, 4  ;;  %s412_s10 = int_to_ptr.hbm [resolvable:$true] %s411_s10  ;;  %s414_s15 = int_to_ptr.vmem [resolvable:$true] %s413_s15 }
  0x4e   : > { %s2586_s25 = sshra.s32 %s412_s10, 4  ;;  %s2593_s20 = scalar_lea.hbm %s3404_s5, 8  ;;  %s2587_s25 = int_to_ptr.hbm [resolvable:$true] %s2586_s25 }
  0x4f   : > { %s2588_s2 = scalar_lea.hbm %s2587_s25, 4  ;;  %p2594_p0 = scmp.lt.s32.totalorder %s2587_s25, %s3404_s5 }
  0x50   : > { %p2589_p7 = scmp.ne.s32.totalorder %s2587_s25, %s2588_s2  ;;  %p2595_p2 = scmp.lt.s32.totalorder %s2593_s20, %s2588_s2 }
  0x52   : > { %p2591_p10 = pnand %p2589_p7, %p2896_p1  ;;  %p2596_p3 = por %p2595_p2, %p2594_p0 }
  0x54   : > { %p2592_p12 = pneg %p2591_p10 }
  0x56   : > { %p2597_p4 = pnand %p2596_p3, %p2592_p12 }
  0x58   : > { %2600 = shalt.err (!%p2597_p4)
}
  0x59   : > { %2404 = dma.hbm_to_vmem [thread:$0]  (!%p2881_p13), %s412_s10, 64, %s414_s15, %s2892_s22  }
  0x5a   : > { %s2358_s7 = smul.u32 600, %s2877_s12  ;;  %s3431_s1 = sld [smem:[#allocation19_spill]] }
  0x5b   : > { %s2359_s28 = smul.u32 600, %s2748_s16  ;;  %s2623_s29 = scalar_lea.hbm %s3405_s6, 1200 }
  0x5c   : > { %s424_s2 = scalar_lea.vmem [#allocation10], %s2358_s7 }
  0x5d   : > { %s429_s25 = scalar_lea.hbm %s3405_s6, %s2359_s28  ;;  %s432_s21 = sshll.u32 %s424_s2, 4  ;;  %s433_s21 = int_to_ptr.vmem [resolvable:$true] %s432_s21 }
  0x5e   : > { %s430_s20 = sshll.u32 %s429_s25, 4  ;;  %s431_s20 = int_to_ptr.hbm [resolvable:$true] %s430_s20 }
  0x5f   : > { %s2616_s11 = sshra.s32 %s431_s20, 4  ;;  %s2617_s11 = int_to_ptr.hbm [resolvable:$true] %s2616_s11 }
  0x60   : > { %s327_s19 = sshll.u32 %s3431_s1, 4  ;;  %s2618_s26 = scalar_lea.hbm %s2617_s11, 600  ;;  %s328_s19 = int_to_ptr.hbm [resolvable:$true] %s327_s19 }
  0x61   : > { %p2619_p6 = scmp.ne.s32.totalorder %s2617_s11, %s2618_s26  ;;  %p2624_p12 = scmp.lt.s32.totalorder %s2617_s11, %s3405_s6 }
  0x62   : > { %p2625_p0 = scmp.lt.s32.totalorder %s2623_s29, %s2618_s26 }
  0x63   : > { %p2621_p7 = pnand %p2619_p6, %p2896_p1 }
  0x64   : > { %p2626_p2 = por %p2625_p0, %p2624_p12 }
  0x65   : > { %p2622_p10 = pneg %p2621_p7 }
  0x67   : > { %p2627_p3 = pnand %p2626_p2, %p2622_p10 }
  0x69   : > { %2630 = shalt.err (!%p2627_p3)
}
  0x6a   : > { %s2753_s7 = smov 192   ;;  %s2754_s28 = smov 12  }
  0x6b   : > { %2407 = dma.hbm_to_vmem [thread:$0]  (!%p2881_p13), %s431_s20, 9600, %s433_s21, %s2892_s22, %s2753_s7, %s2753_s7, %s2754_s28  }
  0x6c   : > { %s2360_s0 = smul.u32 3, %s2877_s12  ;;  %s2755_s25 = smov [#allocation4]  }
  0x6d   : > { %s329_s2 = sshll.u32 %s2755_s25, 4  ;;  %s2361_s10 = smul.u32 3, %s2748_s16  ;;  %s330_s2 = int_to_ptr.vmem [resolvable:$true] %s329_s2 }
  0x6e   : > { %2391 = dma.hbm_to_vmem [thread:$0]  (!%p2870_p11), %s328_s19, 128, %s330_s2, [#allocation5]  }
  0x6f   : > { %s457_s15 = scalar_lea.hbm %s3407_s8, %s2361_s10  ;;  %s453_s29 = scalar_lea.vmem [#allocation11], %s2360_s0 }
  0x70   : > { %s461_s9 = sshll.u32 %s453_s29, 4  ;;  %s459_s18 = sshll.u32 %s457_s15, 4  ;;  %s462_s9 = int_to_ptr.vmem [resolvable:$true] %s461_s9  ;;  %s460_s18 = int_to_ptr.hbm [resolvable:$true] %s459_s18 }
  0x71   : > { %s2676_s1 = sshra.s32 %s460_s18, 4  ;;  %s2683_s30 = scalar_lea.hbm %s3407_s8, 6  ;;  %s2677_s1 = int_to_ptr.hbm [resolvable:$true] %s2676_s1 }
  0x72   : > { %s2678_s21 = scalar_lea.hbm %s2677_s1, 3  ;;  %p2684_p11 = scmp.lt.s32.totalorder %s2677_s1, %s3407_s8 }
  0x73   : > { %p2679_p4 = scmp.ne.s32.totalorder %s2677_s1, %s2678_s21  ;;  %p2685_p10 = scmp.lt.s32.totalorder %s2683_s30, %s2678_s21 }
  0x75   : > { %p2681_p6 = pnand %p2679_p4, %p2896_p1  ;;  %p2686_p12 = por %p2685_p10, %p2684_p11 }
  0x77   : > { %p2682_p7 = pneg %p2681_p6 }
  0x79   : > { %p2687_p0 = pnand %p2686_p12, %p2682_p7 }
  0x7b   : > { %2690 = shalt.err (!%p2687_p0)
}
  0x7c   : > { %2410 = dma.hbm_to_vmem [thread:$0]  (!%p2881_p13), %s460_s18, 48, %s462_s9, %s2892_s22  }
  0x7d   : > { %476 = sbr.rel (%p2859_p9) target bundleno = 664 (0x298), region = 60 }
  0x82   : > { %2723 = dma.done.wait (%p85_p5), [#allocation3], 128  }
  0x83   : > { %2725 = vsyncadd (%p85_p5), [#allocation3], 4294967168 }
  0x84   : > { %2727 = dma.done.wait (%p85_p5), [#allocation5], 128  }
  0x85   : > { %2729 = vsyncadd (%p85_p5), [#allocation5], 4294967168  ;;  %s488_s1 = sand.u32 1, %s2831_s17   ;;  %s3006_s13 = sand.u32 1, %s2740_s14  }
  0x86   : > { %s1923_s24 = sshll.u32 %s3006_s13, 6  ;;  %s489_s22 = scalar_lea.sflag [#allocation3], %s488_s1 }
  0x87   : > { %s3009_s27 = scalar_lea.vmem [#allocation6], %s1923_s24 }
  0x88   : > { %2731 = dma.done.wait (%p2855_p8), %s489_s22, 11056  }
  0x89   : > { %2733 = vsyncadd (%p2855_p8), %s489_s22, 4294956240  ;;  %s1924_s7 = sshll.u32 %s3006_s13, 4  ;;  %v625_v2 = vld [vmem:[#allocation4] sm:$0xff]  ;;  %v2280_v7 = vld [vmem:[%s3009_s27 + $0x2c] sm:$0xf]  ;;  %vm651_vm0 = vcmask 1043456  }
  0x8a   : > { %s502_s28 = scalar_lea.vmem [#allocation7], %s1924_s7  ;;  %v1960_v8 = vld [vmem:[%s3009_s27 + $0x38] sm:$0xf0]  ;;  %v1958_v9 = vld [vmem:[%s3009_s27 + $0x28] sm:$0xf]  ;;  %v626_v19 = vpack.c.bf16 %v625_v2, %v625_v2  ;;  %vm647_vm1 = vcmask 64512  }
  0x8b   : > { %v635_v0 = vld [vmem:[%s502_s28] sm:$0xff]  ;;  %v636_v1 = vld [vmem:[%s502_s28 + $0x8] sm:$0xff]  ;;  %v1963_v20 = vor.u32 %v2280_v7, %v1960_v8  ;;  %vm756_vm2 = vcmask 261120   ;;  %s2362_s23 = smul.u32 600, %s3006_s13  ;;  %v2756_v42 = vmov 8.0   ;;  %vm830_vm4 = vcmask 130048  }
  0x8c   : > { %v639_v3 = vunpack.c.l.b16 %v635_v0  ;;  %v640_v4 = vunpack.c.h.b16 %v635_v0  ;;  %v641_v5 = vunpack.c.l.b16 %v636_v1  ;;  %v642_v6 = vunpack.c.h.b16 %v636_v1  ;;  %v2282_v10 = vld [vmem:[%s3009_s27 + $0x34] sm:$0xf0]  ;;  %v2279_v11 = vld [vmem:[%s3009_s27 + $0x24] sm:$0xf]  ;;  %v1952_v16 = vld [vmem:[%s3009_s27 + $0x30] sm:$0xf0] }
  0x8d   : > { %v2276_v17 = vld [vmem:[%s3009_s27 + $0xc] sm:$0xf]  ;;  %v1944_v18 = vld [vmem:[%s3009_s27 + $0x18] sm:$0xf0]  ;;  %v1959_v21 = vor.u32 %v2282_v10, %v1958_v9  ;;  %v1950_v22 = vld [vmem:[%s3009_s27 + $0x20] sm:$0xf]  ;;  %v1955_v30 = vor.u32 %v2279_v11, %v1952_v16  ;;  %2456 = vrcp.f32 %v2756_v42 }
  0x8e   : > { %v643_v12 = vpack.c.b16 %v639_v3, %v639_v3  ;;  %v644_v13 = vpack.c.b16 %v640_v4, %v640_v4  ;;  %v645_v14 = vpack.c.b16 %v641_v5, %v641_v5  ;;  %v646_v15 = vpack.c.b16 %v642_v6, %v642_v6  ;;  %v2281_v23 = vld [vmem:[%s3009_s27 + $0x2c] sm:$0xf0]  ;;  %v1942_v24 = vld [vmem:[%s3009_s27 + $0x8] sm:$0xf]  ;;  %v2278_v29 = vld [vmem:[%s3009_s27 + $0x14] sm:$0xf0] }
  0x8f   : > { %v1951_v31 = vor.u32 %v2281_v23, %v1950_v22  ;;  %v1934_v32 = vld [vmem:[%s3009_s27] sm:$0xf]  ;;  %v1947_v33 = vor.u32 %v2276_v17, %v1944_v18  ;;  %v1943_v34 = vor.u32 %v2278_v29, %v1942_v24  ;;  %v2277_v35 = vld [vmem:[%s3009_s27 + $0xc] sm:$0xf0]  ;;  %v2275_v36 = vld [vmem:[%s3009_s27 + $0x4] sm:$0xf] }
  0x90   : > { %v653_v25 = vsel %vm651_vm0, %v643_v12, 0  ;;  %v656_v26 = vsel %vm651_vm0, %v644_v13, 0  ;;  %v659_v27 = vsel %vm651_vm0, %v645_v14, 0  ;;  %v662_v28 = vsel %vm651_vm0, %v646_v15, 0  ;;  %v1936_v37 = vld [vmem:[%s3009_s27 + $0x10] sm:$0xf0] }
  0x91   : > { %671 = vmatpush.bf16.msra.mxu0 %v653_v25  ;;  %684 = vmatpush.bf16.msra.mxu1 %v656_v26  ;;  %v1935_v38 = vor.u32 %v2277_v35, %v1934_v32  ;;  %v1939_v39 = vor.u32 %v2275_v36, %v1936_v37  ;;  %v623_v40 = vld [vmem:[#allocation2] sm:$0xff]  ;;  %s3041_s0 = scalar_lea.vmem [#allocation10], %s2362_s23  ;;  %vm946_vm8 = vcmask 1040384   ;;  %vm948_vm9 = vcmask 1042434   ;;  %s1925_s25 = sshll.u32 %s3006_s13, 2 }
  0x92   : > { %697 = vmatpush.bf16.msra.mxu2 %v659_v27  ;;  %710 = vmatpush.bf16.msra.mxu3 %v662_v28  ;;  %v624_v41 = vpack.c.bf16 %v623_v40, %v623_v40  ;;  %v2054_v45 = vld [vmem:[%s3041_s0 + $0xa8] sm:$0xf]  ;;  %v2305_v46 = vld [vmem:[%s3041_s0 + $0xb0] sm:$0xf0]  ;;  %v2042_v49 = vld [vmem:[%s3041_s0 + $0x90] sm:$0xf] }
  0x93   : > { %v2055_v47 = vor.u32 %v2305_v46, %v2054_v45  ;;  %v2457_v48 = vpop.eup %2456  ;;  %v2302_v50 = vld [vmem:[%s3041_s0 + $0x98] sm:$0xf0]  ;;  %v2030_v57 = vld [vmem:[%s3041_s0 + $0x78] sm:$0xf]  ;;  %v2299_v58 = vld [vmem:[%s3041_s0 + $0x80] sm:$0xf0] }
  0x94   : > { %1928 = vmatmul.msk.bf16.vlgmr.msra.gmra.mxu0 %vm647_vm1, %v626_v19  ;;  %1929 = vmatmul.msk.bf16.vlgmr.msra.gmra.mxu1 %vm647_vm1, %v626_v19  ;;  %v2043_v51 = vor.u32 %v2302_v50, %v2042_v49  ;;  %v839_v56 = vmul.f32 8.0, %v2457_v48  ;;  %v2031_v59 = vor.u32 %v2299_v58, %v2030_v57  ;;  %v2018_v61 = vld [vmem:[%s3041_s0 + $0x60] sm:$0xf]  ;;  %v2296_v62 = vld [vmem:[%s3041_s0 + $0x68] sm:$0xf0]  ;;  %vm843_vm3 = vweird.f32 %v2457_v48  ;;  %s512_s2 = scalar_lea.vmem [#allocation8], %s1925_s25 }
  0x95   : > { %1930 = vmatmul.msk.bf16.vlgmr.msra.gmra.mxu2 %vm647_vm1, %v626_v19  ;;  %1931 = vmatmul.msk.bf16.vlgmr.msra.gmra.mxu3 %vm647_vm1, %v626_v19  ;;  %v2019_v63 = vor.u32 %v2296_v62, %v2018_v61  ;;  %v2150_v0 = vld [vmem:[%s3041_s0 + $0x168] sm:$0xf]  ;;  %v2329_v1 = vld [vmem:[%s3041_s0 + $0x170] sm:$0xf0]  ;;  %v2138_v13 = vld [vmem:[%s3041_s0 + $0x150] sm:$0xf] }
  0x96   : > { %805 = vmatpush.bf16.msrb.mxu3 %v1963_v20  ;;  %792 = vmatpush.bf16.msrb.mxu2 %v1959_v21  ;;  %v840_v60 = vsub.f32 1.0, %v839_v56  ;;  %v2151_v4 = vor.u32 %v2329_v1, %v2150_v0  ;;  %v2006_v10 = vld [vmem:[%s3041_s0 + $0x48] sm:$0xf]  ;;  %v2293_v11 = vld [vmem:[%s3041_s0 + $0x50] sm:$0xf0]  ;;  %s522_s10 = scalar_lea.vmem [#allocation9], %s1925_s25 }
  0x97   : > { %779 = vmatpush.bf16.msrb.mxu1 %v1955_v30  ;;  %766 = vmatpush.bf16.msrb.mxu0 %v1951_v31  ;;  %v2007_v12 = vor.u32 %v2293_v11, %v2006_v10  ;;  %v2326_v14 = vld [vmem:[%s3041_s0 + $0x158] sm:$0xf0]  ;;  %v1994_v25 = vld [vmem:[%s3041_s0 + $0x30] sm:$0xf]  ;;  %v2126_v28 = vld [vmem:[%s3041_s0 + $0x138] sm:$0xf] }
  0x98   : > { %v841_v6 = vmul.f32 %v2457_v48, %v840_v60  ;;  %v2139_v20 = vor.u32 %v2326_v14, %v2138_v13  ;;  %v2290_v26 = vld [vmem:[%s3041_s0 + $0x38] sm:$0xf0]  ;;  %v2323_v29 = vld [vmem:[%s3041_s0 + $0x140] sm:$0xf0]  ;;  %v1982_v14 = vld [vmem:[%s3041_s0 + $0x18] sm:$0xf] }
  0x99   : > { %v1995_v27 = vor.u32 %v2290_v26, %v1994_v25  ;;  %v2320_v25 = vld [vmem:[%s3041_s0 + $0x128] sm:$0xf0]  ;;  %p611_p5 = scmp.lt.s32.totalorder %s2831_s17, 1  ;;  %s3438_s15 = sld [smem:[#allocation22_spill]] }
  0x9a   : > { %806 = vmatpush.bf16.msrb.mxu3 %v1947_v33  ;;  %793 = vmatpush.bf16.msrb.mxu2 %v1943_v34  ;;  %v842_v19 = vadd.f32 %v2457_v48, %v841_v6  ;;  %s3440_s12 = sld [smem:[#allocation21_spill]]  ;;  %s2363_s19 = smul.u32 3, %s3006_s13 }
  0x9b   : > { %767 = vmatpush.bf16.msrb.mxu0 %v1935_v38  ;;  %780 = vmatpush.bf16.msrb.mxu1 %v1939_v39  ;;  %s3448_s17 = smov (!%p611_p5, %s2831_s17), 1  ;;  %s3441_s7 = sld [smem:[#allocation23_spill]] }
  0x9c   : > { %v3074_v36 = vsel %vm843_vm3, %v2457_v48, %v842_v19  ;;  %vm950_vm3 = vcmask 1041408   ;;  %s2364_s18 = smul.u32 3, %s3448_s17  ;;  %s542_s20 = scalar_lea.vmem [#allocation11], %s2363_s19 }
  0x9d   : > { %s1927_s1 = sshll.u32 %s3448_s17, 3 }
  0x9f   : > { %1516 = vmatpush.bf16.msra.mxu0 %v2055_v47  ;;  %1529 = vmatpush.bf16.msra.mxu1 %v2151_v4  ;;  %s617_s9 = scalar_lea.vmem %s3438_s15, %s3448_s17 }
  0xa0   : > { %s614_s30 = scalar_lea.vmem %s3440_s12, %s2364_s18 }
  0xa1   : > { %s621_s28 = scalar_lea.vmem %s3441_s7, %s1927_s1 }
  0xa3   : > { %1517 = vmatpush.bf16.msra.mxu0 %v2043_v51  ;;  %1530 = vmatpush.bf16.msra.mxu1 %v2139_v20 }
  0xa4   : > { %1964 = vmatmul.msk.bf16.vlgmr.msrb.gmra.mxu0 %vm756_vm2, %v624_v41  ;;  %1965 = vmatmul.msk.bf16.vlgmr.msrb.gmra.mxu1 %vm756_vm2, %v624_v41 }
  0xa5   : > { %1966 = vmatmul.msk.bf16.vlgmr.msrb.gmra.mxu2 %vm756_vm2, %v624_v41  ;;  %1967 = vmatmul.msk.bf16.vlgmr.msrb.gmra.mxu3 %vm756_vm2, %v624_v41  ;;  %v2127_v41 = vor.u32 %v2323_v29, %v2126_v28 }
  0xa7   : > { %1518 = vmatpush.bf16.msra.mxu0 %v2031_v59  ;;  %1531 = vmatpush.bf16.msra.mxu1 %v2127_v41  ;;  %v1970_v41 = vld [vmem:[%s3041_s0] sm:$0xf] }
  0xab   : > { %1519 = vmatpush.bf16.msra.mxu0 %v2019_v63 }
  0xaf   : > { %1520 = vmatpush.bf16.msra.mxu0 %v2007_v12 }
  0xb3   : > { %1521 = vmatpush.bf16.msra.mxu0 %v1995_v27 }
 0x111   : > { %v673_v43 = vpop.f32.mrf.mxu0  ;;  %v686_v44 = vpop.f32.mrf.mxu1 }
 0x118   : > { %v699_v52 = vpop.f32.mrf.mxu2  ;;  %v712_v53 = vpop.f32.mrf.mxu3 }
 0x119   : > { %v675_v54 = vpop.f32.mrf.mxu0  ;;  %v688_v55 = vpop.f32.mrf.mxu1 }
 0x120   : > { %v701_v2 = vpop.f32.mrf.mxu2  ;;  %v714_v3 = vpop.f32.mrf.mxu3 }
 0x121   : > { %v769_v5 = vpop.f32.mrf.mxu0  ;;  %v782_v7 = vpop.f32.mrf.mxu1 }
 0x122   : > { %v3053_v8 = vadd.f32 %v769_v5, %v673_v43  ;;  %v3055_v9 = vadd.f32 %v782_v7, %v686_v44 }
 0x124   : > { %v812_v15 = vrot.slane %v3053_v8, 4  ;;  %v849_v16 = vmul.f32 %v3053_v8, %v3053_v8  ;;  %v818_v17 = vrot.slane %v3055_v9, 4  ;;  %v850_v18 = vmul.f32 %v3055_v9, %v3055_v9 }
 0x126   : > { %v813_v21 = vadd.f32 %v812_v15, %v3053_v8  ;;  %v853_v22 = vrot.slane %v849_v16, 4  ;;  %v819_v23 = vadd.f32 %v818_v17, %v3055_v9  ;;  %v859_v24 = vrot.slane %v850_v18, 4  ;;  %v2287_v15 = vld [vmem:[%s3041_s0 + $0x20] sm:$0xf0] }
 0x127   : > { %v1983_v28 = vor.u32 %v2287_v15, %v1982_v14  ;;  %v2044_v15 = vld [vmem:[%s3041_s0 + $0x9c] sm:$0xf0] }
 0x128   : > { %v814_v30 = vrot.slane %v813_v21, 2  ;;  %v854_v31 = vadd.f32 %v853_v22, %v849_v16  ;;  %v820_v32 = vrot.slane %v819_v23, 2  ;;  %v860_v33 = vadd.f32 %v859_v24, %v850_v18  ;;  %v795_v34 = vpop.f32.mrf.mxu2  ;;  %v808_v35 = vpop.f32.mrf.mxu3  ;;  %v2114_v24 = vld [vmem:[%s3041_s0 + $0x120] sm:$0xf] }
 0x129   : > { %v3076_v37 = vadd.f32 %v795_v34, %v699_v52  ;;  %v3078_v38 = vadd.f32 %v808_v35, %v712_v53  ;;  %v784_v39 = vpop.f32.mrf.mxu1  ;;  %v771_v40 = vpop.f32.mrf.mxu0  ;;  %v2353_v34 = vld [vmem:[%s3041_s0 + $0x230] sm:$0xf0]  ;;  %1522 = vmatpush.bf16.msra.mxu0 %v1983_v28 }
 0x12a   : > { %v815_v42 = vadd.f32 %v814_v30, %v813_v21  ;;  %v855_v43 = vrot.slane %v854_v31, 2  ;;  %v821_v44 = vadd.f32 %v820_v32, %v819_v23  ;;  %v861_v45 = vrot.slane %v860_v33, 2 }
 0x12b   : > { %v824_v46 = vrot.slane %v3076_v37, 4  ;;  %v851_v47 = vmul.f32 %v3076_v37, %v3076_v37  ;;  %v831_v48 = vsel %vm830_vm4, %v3078_v38, 0.0  ;;  %v852_v49 = vmul.f32 %v3078_v38, %v3078_v38 }
 0x12c   : > { %v816_v50 = vrot.slane %v815_v42, 1  ;;  %v856_v51 = vadd.f32 %v855_v43, %v854_v31  ;;  %v822_v52 = vrot.slane %v821_v44, 1  ;;  %v862_v53 = vadd.f32 %v861_v45, %v860_v33  ;;  %v2246_v33 = vld [vmem:[%s3041_s0 + $0x228] sm:$0xf] }
 0x12d   : > { %v825_v54 = vadd.f32 %v824_v46, %v3076_v37  ;;  %v865_v55 = vrot.slane %v851_v47, 4  ;;  %v832_v56 = vrot.slane %v831_v48, 4  ;;  %v871_v57 = vsel %vm830_vm4, %v852_v49, 0.0  ;;  %v2102_v49 = vld [vmem:[%s3041_s0 + $0x108] sm:$0xf] }
 0x12e   : > { %v817_v58 = vadd.f32 %v816_v50, %v815_v42  ;;  %v857_v59 = vrot.slane %v856_v51, 1  ;;  %v823_v60 = vadd.f32 %v822_v52, %v821_v44  ;;  %v863_v61 = vrot.slane %v862_v53, 1  ;;  %v2284_v42 = vld [vmem:[%s3041_s0 + $0x8] sm:$0xf0]  ;;  %v2317_v50 = vld [vmem:[%s3041_s0 + $0x110] sm:$0xf0] }
 0x12f   : > { %v826_v62 = vrot.slane %v825_v54, 2  ;;  %v866_v63 = vadd.f32 %v865_v55, %v851_v47  ;;  %v833_v0 = vadd.f32 %v832_v56, %v831_v48  ;;  %v872_v1 = vrot.slane %v871_v57, 4  ;;  %v2258_v47 = vld [vmem:[%s3041_s0 + $0x240] sm:$0xf]  ;;  %v2356_v48 = vld [vmem:[%s3041_s0 + $0x248] sm:$0xf0] }
 0x130   : > { %v3090_v2 = vmul.f32 %v3074_v36, %v817_v58  ;;  %v858_v3 = vadd.f32 %v857_v59, %v856_v51  ;;  %v3093_v4 = vmul.f32 %v3074_v36, %v823_v60  ;;  %v864_v5 = vadd.f32 %v863_v61, %v862_v53  ;;  %v797_v6 = vpop.f32.mrf.mxu2  ;;  %v810_v7 = vpop.f32.mrf.mxu3  ;;  %v2056_v59 = vld [vmem:[%s3041_s0 + $0xb4] sm:$0xf0]  ;;  %v2328_v60 = vld [vmem:[%s3041_s0 + $0x16c] sm:$0xf] }
 0x131   : > { %v827_v10 = vadd.f32 %v826_v62, %v825_v54  ;;  %v867_v11 = vrot.slane %v866_v63, 2  ;;  %v834_v12 = vrot.slane %v833_v0, 2  ;;  %v873_v13 = vadd.f32 %v872_v1, %v871_v57  ;;  %v2304_v54 = vld [vmem:[%s3041_s0 + $0xac] sm:$0xf]  ;;  %v2152_v61 = vld [vmem:[%s3041_s0 + $0x174] sm:$0xf0] }
 0x132   : > { %v878_v16 = vmul.f32 %v858_v3, %v3074_v36  ;;  %v882_v17 = vmul.f32 %v3090_v2, %v3090_v2  ;;  %v879_v18 = vmul.f32 %v864_v5, %v3074_v36  ;;  %v883_v19 = vmul.f32 %v3093_v4, %v3093_v4  ;;  %v2090_v6 = vld [vmem:[%s3041_s0 + $0xf0] sm:$0xf]  ;;  %v2314_v7 = vld [vmem:[%s3041_s0 + $0xf8] sm:$0xf0] }
 0x133   : > { %v828_v20 = vrot.slane %v827_v10, 1  ;;  %v868_v21 = vadd.f32 %v867_v11, %v866_v63  ;;  %v835_v22 = vadd.f32 %v834_v12, %v833_v0  ;;  %v874_v23 = vrot.slane %v873_v13, 2  ;;  %v2234_v63 = vld [vmem:[%s3041_s0 + $0x210] sm:$0xf]  ;;  %v2350_v0 = vld [vmem:[%s3041_s0 + $0x218] sm:$0xf0] }
 0x134   : > { %v886_v26 = vsub.f32 %v878_v16, %v882_v17  ;;  %v887_v27 = vsub.f32 %v879_v18, %v883_v19  ;;  %v2115_v40 = vor.u32 %v2320_v25, %v2114_v24  ;;  %v2247_v53 = vor.u32 %v2353_v34, %v2246_v33  ;;  %v2325_v16 = vld [vmem:[%s3041_s0 + $0x154] sm:$0xf]  ;;  %v2140_v17 = vld [vmem:[%s3041_s0 + $0x15c] sm:$0xf0]  ;;  %v2311_v24 = vld [vmem:[%s3041_s0 + $0xe0] sm:$0xf0] }
 0x135   : > { %v829_v29 = vadd.f32 %v828_v20, %v827_v10  ;;  %v869_v30 = vrot.slane %v868_v21, 1  ;;  %v836_v31 = vrot.slane %v835_v22, 1  ;;  %v875_v32 = vadd.f32 %v874_v23, %v873_v13  ;;  %v2301_v10 = vld [vmem:[%s3041_s0 + $0x94] sm:$0xf]  ;;  %v2222_v20 = vld [vmem:[%s3041_s0 + $0x1f8] sm:$0xf] }
 0x136   : > { %v890_v35 = vmax.f32 %v886_v26, 0.0  ;;  %v891_v39 = vmax.f32 %v887_v27, 0.0  ;;  %1532 = vmatpush.bf16.msra.mxu1 %v2115_v40  ;;  %1542 = vmatpush.bf16.msra.mxu2 %v2247_v53  ;;  %v1971_v62 = vor.u32 %v2284_v42, %v1970_v41  ;;  %v2259_v11 = vor.u32 %v2356_v48, %v2258_v47  ;;  %v2078_v23 = vld [vmem:[%s3041_s0 + $0xd8] sm:$0xf]  ;;  %v2322_v33 = vld [vmem:[%s3041_s0 + $0x13c] sm:$0xf] }
 0x137   : > { %v3110_v43 = vmul.f32 %v3074_v36, %v829_v29  ;;  %v870_v44 = vadd.f32 %v869_v30, %v868_v21  ;;  %v837_v45 = vadd.f32 %v836_v31, %v835_v22  ;;  %v876_v46 = vrot.slane %v875_v32, 1  ;;  %v2347_v21 = vld [vmem:[%s3041_s0 + $0x200] sm:$0xf0]  ;;  %v2298_v29 = vld [vmem:[%s3041_s0 + $0x7c] sm:$0xf] }
 0x138   : > { %v3116_v51 = vadd.f32 1e-05, %v890_v35  ;;  %v3118_v52 = vadd.f32 1e-05, %v891_v39  ;;  %1523 = vmatpush.bf16.msra.mxu0 %v1971_v62  ;;  %v2103_v12 = vor.u32 %v2317_v50, %v2102_v49  ;;  %v2059_v13 = vor.u32 %v2304_v54, %v2056_v59  ;;  %1562 = vmatpush.bf16.msra.mxu3 %v2259_v11  ;;  %v2128_v34 = vld [vmem:[%s3041_s0 + $0x144] sm:$0xf0] }
 0x139   : > { %v880_v55 = vmul.f32 %v870_v44, %v3074_v36  ;;  %v884_v56 = vmul.f32 %v3110_v43, %v3110_v43  ;;  %v3125_v57 = vmul.f32 %v3074_v36, %v837_v45  ;;  %v877_v58 = vadd.f32 %v876_v46, %v875_v32  ;;  %v2032_v32 = vld [vmem:[%s3041_s0 + $0x84] sm:$0xf0]  ;;  %v2210_v40 = vld [vmem:[%s3041_s0 + $0x1e0] sm:$0xf]  ;;  %v2344_v41 = vld [vmem:[%s3041_s0 + $0x1e8] sm:$0xf0] }
 0x13a   : > { %2458 = vrsqrt.f32 %v3116_v51  ;;  %v2155_v14 = vor.u32 %v2328_v60, %v2152_v61  ;;  %v2235_v19 = vor.u32 %v2350_v0, %v2234_v63  ;;  %1533 = vmatpush.bf16.msra.mxu1 %v2103_v12  ;;  %v2091_v22 = vor.u32 %v2314_v7, %v2090_v6  ;;  %v2066_v46 = vld [vmem:[%s3041_s0 + $0xc0] sm:$0xf]  ;;  %v2308_v49 = vld [vmem:[%s3041_s0 + $0xc8] sm:$0xf0]  ;;  %v2295_v50 = vld [vmem:[%s3041_s0 + $0x64] sm:$0xf] }
 0x13b   : > { %2460 = vrsqrt.f32 %v3118_v52  ;;  %v888_v1 = vsub.f32 %v880_v55, %v884_v56  ;;  %v881_v3 = vmul.f32 %v877_v58, %v3074_v36  ;;  %v885_v5 = vmul.f32 %v3125_v57, %v3125_v57  ;;  %v2020_v53 = vld [vmem:[%s3041_s0 + $0x6c] sm:$0xf0]  ;;  %v2319_v56 = vld [vmem:[%s3041_s0 + $0x124] sm:$0xf]  ;;  %v2198_v59 = vld [vmem:[%s3041_s0 + $0x1c8] sm:$0xf] }
 0x13c   : > { %1568 = vmatpush.bf16.msrb.mxu3 %v2059_v13  ;;  %1581 = vmatpush.bf16.msrb.mxu0 %v2155_v14  ;;  %v2047_v27 = vor.u32 %v2301_v10, %v2044_v15  ;;  %v2143_v28 = vor.u32 %v2325_v16, %v2140_v17  ;;  %v2223_v31 = vor.u32 %v2347_v21, %v2222_v20  ;;  %v2116_v58 = vld [vmem:[%s3041_s0 + $0x12c] sm:$0xf0]  ;;  %v2341_v60 = vld [vmem:[%s3041_s0 + $0x1d0] sm:$0xf0]  ;;  %v2352_v61 = vld [vmem:[%s3041_s0 + $0x22c] sm:$0xf]  ;;  %vm915_vm6 = vweird.f32 %v3118_v52 }
 0x13d   : > { %v892_v18 = vmax.f32 %v888_v1, 0.0  ;;  %v889_v36 = vsub.f32 %v881_v3, %v885_v5  ;;  %1543 = vmatpush.bf16.msra.mxu2 %v2235_v19  ;;  %v2079_v45 = vor.u32 %v2311_v24, %v2078_v23  ;;  %v2035_v47 = vor.u32 %v2298_v29, %v2032_v32  ;;  %v2248_v62 = vld [vmem:[%s3041_s0 + $0x234] sm:$0xf0]  ;;  %v2292_v3 = vld [vmem:[%s3041_s0 + $0x4c] sm:$0xf] }
 0x13e   : > { %1534 = vmatpush.bf16.msra.mxu1 %v2091_v22  ;;  %v2131_v48 = vor.u32 %v2322_v33, %v2128_v34  ;;  %v2211_v55 = vor.u32 %v2344_v41, %v2210_v40  ;;  %v2067_v1 = vor.u32 %v2308_v49, %v2066_v46  ;;  %v2023_v6 = vor.u32 %v2295_v50, %v2020_v53  ;;  %v2008_v10 = vld [vmem:[%s3041_s0 + $0x54] sm:$0xf0]  ;;  %v2316_v11 = vld [vmem:[%s3041_s0 + $0x10c] sm:$0xf]  ;;  %v2186_v17 = vld [vmem:[%s3041_s0 + $0x1b0] sm:$0xf] }
 0x13f   : > { %v3147_v25 = vadd.f32 1e-05, %v892_v18  ;;  %v893_v26 = vmax.f32 %v889_v36, 0.0  ;;  %v2119_v7 = vor.u32 %v2319_v56, %v2116_v58  ;;  %v2104_v12 = vld [vmem:[%s3041_s0 + $0x114] sm:$0xf0]  ;;  %v2199_v15 = vor.u32 %v2341_v60, %v2198_v59 }
 0x140   : > { %v3150_v30 = vpop.eup %2458  ;;  %1569 = vmatpush.bf16.msrb.mxu3 %v2047_v27  ;;  %1582 = vmatpush.bf16.msrb.mxu0 %v2143_v28  ;;  %v2251_v16 = vor.u32 %v2352_v61, %v2248_v62  ;;  %v2338_v18 = vld [vmem:[%s3041_s0 + $0x1b8] sm:$0xf0]  ;;  %v2349_v19 = vld [vmem:[%s3041_s0 + $0x214] sm:$0xf]  ;;  %v2236_v20 = vld [vmem:[%s3041_s0 + $0x21c] sm:$0xf0]  ;;  %v2011_v28 = vor.u32 %v2292_v3, %v2008_v10  ;;  %v2107_v29 = vor.u32 %v2316_v11, %v2104_v12  ;;  %vm905_vm1 = vweird.f32 %v3116_v51 }
 0x141   : > { %v3155_v35 = vpop.eup %2460  ;;  %2462 = vrsqrt.f32 %v3147_v25  ;;  %v3158_v39 = vadd.f32 1e-05, %v893_v26  ;;  %v900_v42 = vmul.f32 %v3150_v30, %v3116_v51  ;;  %1544 = vmatpush.bf16.msra.mxu2 %v2223_v31  ;;  %v3194_v21 = vld [vmem:[%s3041_s0 + $0x34] sm:$0xf]  ;;  %v1996_v26 = vld [vmem:[%s3041_s0 + $0x3c] sm:$0xf0]  ;;  %v2187_v31 = vor.u32 %v2338_v18, %v2186_v17 }
 0x142   : > { %v910_v44 = vmul.f32 %v3155_v35, %v3118_v52  ;;  %1535 = vmatpush.bf16.msra.mxu1 %v2079_v45  ;;  %v2313_v27 = vld [vmem:[%s3041_s0 + $0xf4] sm:$0xf]  ;;  %vm916_vm5 = vweird.f32 %v3155_v35  ;;  %v2092_v32 = vld [vmem:[%s3041_s0 + $0xfc] sm:$0xf0]  ;;  %v2174_v33 = vld [vmem:[%s3041_s0 + $0x198] sm:$0xf]  ;;  %v1999_v53 = vor.u32 %v3194_v21, %v1996_v26  ;;  %vm925_vm11 = vweird.f32 %v3147_v25 }
 0x143   : > { %2464 = vrsqrt.f32 %v3158_v39  ;;  %v901_v63 = vmul.f32 %v3150_v30, %v900_v42  ;;  %v2335_v34 = vld [vmem:[%s3041_s0 + $0x1a0] sm:$0xf0]  ;;  %v2346_v45 = vld [vmem:[%s3041_s0 + $0x1fc] sm:$0xf]  ;;  %v2224_v46 = vld [vmem:[%s3041_s0 + $0x204] sm:$0xf0]  ;;  %v2095_v52 = vor.u32 %v2313_v27, %v2092_v32  ;;  %vm906_vm14 = vweird.f32 %v3150_v30 }
 0x144   : > { %v911_v54 = vmul.f32 %v3155_v35, %v910_v44  ;;  %1570 = vmatpush.bf16.msrb.mxu3 %v2035_v47  ;;  %1583 = vmatpush.bf16.msrb.mxu0 %v2131_v48  ;;  %v2239_v44 = vor.u32 %v2349_v19, %v2236_v20  ;;  %vm3213_vm10 = vmor %vm915_vm6, %vm916_vm5  ;;  %v2286_v56 = vld [vmem:[%s3041_s0 + $0x1c] sm:$0xf]  ;;  %v1984_v58 = vld [vmem:[%s3041_s0 + $0x24] sm:$0xf0]  ;;  %vm935_vm15 = vweird.f32 %v3158_v39  ;;  %vm1697_vm5 = vcmask 7168  }
 0x145   : > { %1545 = vmatpush.bf16.msra.mxu2 %v2211_v55  ;;  %v902_v22 = vmul.f32 0.5, %v901_v63  ;;  %v2227_v55 = vor.u32 %v2346_v45, %v2224_v46  ;;  %v2310_v59 = vld [vmem:[%s3041_s0 + $0xdc] sm:$0xf]  ;;  %v2080_v63 = vld [vmem:[%s3041_s0 + $0xe4] sm:$0xf0]  ;;  %vm907_vm2 = vmor %vm905_vm1, %vm906_vm14 }
 0x146   : > { %v912_v0 = vmul.f32 0.5, %v911_v54  ;;  %1536 = vmatpush.bf16.msra.mxu1 %v2067_v1  ;;  %v2175_v54 = vor.u32 %v2335_v34, %v2174_v33  ;;  %v2332_v1 = vld [vmem:[%s3041_s0 + $0x188] sm:$0xf0]  ;;  %v2343_v3 = vld [vmem:[%s3041_s0 + $0x1e4] sm:$0xf] }
 0x147   : > { %v3180_v5 = vpop.eup %2462  ;;  %v903_v49 = vsub.f32 1.5, %v902_v22  ;;  %v2355_v11 = vld [vmem:[%s3041_s0 + $0x244] sm:$0xf]  ;;  %v2260_v12 = vld [vmem:[%s3041_s0 + $0x24c] sm:$0xf0] }
 0x148   : > { %v913_v13 = vsub.f32 1.5, %v912_v0  ;;  %v920_v14 = vmul.f32 %v3180_v5, %v3147_v25  ;;  %1571 = vmatpush.bf16.msrb.mxu3 %v2023_v6  ;;  %1584 = vmatpush.bf16.msrb.mxu0 %v2119_v7  ;;  %vm926_vm7 = vweird.f32 %v3180_v5  ;;  %v2162_v0 = vld [vmem:[%s3041_s0 + $0x180] sm:$0xf]  ;;  %v2212_v6 = vld [vmem:[%s3041_s0 + $0x1ec] sm:$0xf0] }
 0x149   : > { %v3189_v36 = vpop.eup %2464  ;;  %1546 = vmatpush.bf16.msra.mxu2 %v2199_v15  ;;  %vm3225_vm12 = vmor %vm925_vm11, %vm926_vm7  ;;  %v2283_v17 = vld [vmem:[%s3041_s0 + $0x4] sm:$0xf]  ;;  %v2163_v19 = vor.u32 %v2332_v1, %v2162_v0  ;;  %v2215_v20 = vor.u32 %v2343_v3, %v2212_v6  ;;  %v2068_v22 = vld [vmem:[%s3041_s0 + $0xcc] sm:$0xf0] }
 0x14a   : > { %v921_v23 = vmul.f32 %v3180_v5, %v920_v14  ;;  %v930_v24 = vmul.f32 %v3189_v36, %v3158_v39  ;;  %v914_v41 = vmul.f32 %v3155_v35, %v913_v13  ;;  %1594 = vmatpush.bf16.msrb.mxu1 %v2251_v16  ;;  %vm936_vm13 = vweird.f32 %v3189_v36  ;;  %v1972_v39 = vld [vmem:[%s3041_s0 + $0xc] sm:$0xf0]  ;;  %v2307_v21 = vld [vmem:[%s3041_s0 + $0xc4] sm:$0xf]  ;;  %v2340_v26 = vld [vmem:[%s3041_s0 + $0x1cc] sm:$0xf] }
 0x14b   : > { %vm3250_vm0 = vmor %vm935_vm15, %vm936_vm13  ;;  %v1987_v16 = vor.u32 %v2286_v56, %v1984_v58  ;;  %v2200_v27 = vld [vmem:[%s3041_s0 + $0x1d4] sm:$0xf0]  ;;  %v894_v51 = vld [vmem:[%s512_s2] sm:$0xf]  ;;  %v2071_v32 = vor.u32 %v2307_v21, %v2068_v22 }
 0x14c   : > { %v922_v40 = vmul.f32 0.5, %v921_v23  ;;  %v931_v42 = vmul.f32 %v3189_v36, %v930_v24  ;;  %1572 = vmatpush.bf16.msrb.mxu3 %v2011_v28  ;;  %1585 = vmatpush.bf16.msrb.mxu0 %v2107_v29  ;;  %v918_v25 = vsel %vm3213_vm10, %v3155_v35, %v914_v41  ;;  %v904_v35 = vmul.f32 %v3150_v30, %v903_v49  ;;  %v2337_v41 = vld [vmem:[%s3041_s0 + $0x1b4] sm:$0xf] }
 0x14d   : > { %1547 = vmatpush.bf16.msra.mxu2 %v2187_v31  ;;  %v943_v14 = vrot.slane %v918_v25, 7  ;;  %v2263_v24 = vor.u32 %v2355_v11, %v2260_v12  ;;  %v1975_v28 = vor.u32 %v2283_v17, %v1972_v39  ;;  %v2203_v34 = vor.u32 %v2340_v26, %v2200_v27  ;;  %v2331_v25 = vld [vmem:[%s3041_s0 + $0x184] sm:$0xf]  ;;  %v2062_v11 = vld [vmem:[%s3041_s0 + $0xb0] sm:$0xf] }
 0x14e   : > { %v923_v48 = vsub.f32 1.5, %v922_v40  ;;  %v932_v50 = vmul.f32 0.5, %v931_v42  ;;  %1595 = vmatpush.bf16.msrb.mxu1 %v2239_v44  ;;  %v2188_v42 = vld [vmem:[%s3041_s0 + $0x1bc] sm:$0xf0] }
 0x14f   : > { %v2191_v47 = vor.u32 %v2337_v41, %v2188_v42  ;;  %v2038_v42 = vld [vmem:[%s3041_s0 + $0x80] sm:$0xf] }
 0x150   : > { %v924_v61 = vmul.f32 %v3180_v5, %v923_v48  ;;  %v933_v62 = vsub.f32 1.5, %v932_v50  ;;  %1573 = vmatpush.bf16.msrb.mxu3 %v1999_v53  ;;  %1586 = vmatpush.bf16.msrb.mxu0 %v2095_v52  ;;  %v2334_v53 = vld [vmem:[%s3041_s0 + $0x19c] sm:$0xf]  ;;  %v2176_v52 = vld [vmem:[%s3041_s0 + $0x1a4] sm:$0xf0] }
 0x151   : > { %1548 = vmatpush.bf16.msra.mxu2 %v2175_v54  ;;  %v2179_v60 = vor.u32 %v2334_v53, %v2176_v52  ;;  %v2026_v53 = vld [vmem:[%s3041_s0 + $0x68] sm:$0xf] }
 0x152   : > { %v928_v7 = vsel %vm3225_vm12, %v3180_v5, %v924_v61  ;;  %v934_v10 = vmul.f32 %v3189_v36, %v933_v62  ;;  %v2083_v5 = vor.u32 %v2310_v59, %v2080_v63  ;;  %1596 = vmatpush.bf16.msrb.mxu1 %v2227_v55  ;;  %v954_v59 = vld [vmem:[%s522_s10] sm:$0xf]  ;;  %v2164_v61 = vld [vmem:[%s3041_s0 + $0x18c] sm:$0xf0] }
 0x153   : > { %v944_v15 = vrot.slane %v928_v7, 6 }
 0x154   : > { %v938_v18 = vsel %vm3250_vm0, %v3189_v36, %v934_v10  ;;  %v908_v36 = vsel %vm907_vm2, %v3150_v30, %v904_v35  ;;  %1574 = vmatpush.bf16.msrb.mxu3 %v1987_v16  ;;  %1587 = vmatpush.bf16.msrb.mxu0 %v2083_v5  ;;  %v2330_v16 = vld [vmem:[%s3041_s0 + $0x178] sm:$0xf0] }
 0x155   : > { %v945_v23 = vrot.slane %v938_v18, 5  ;;  %v947_v29 = vsel %vm946_vm8, %v908_v36, %v943_v14  ;;  %1549 = vmatpush.bf16.msra.mxu2 %v2163_v19  ;;  %v2354_v5 = vld [vmem:[%s3041_s0 + $0x238] sm:$0xf0] }
 0x156   : > { %1597 = vmatpush.bf16.msrb.mxu1 %v2215_v20  ;;  %v2357_v20 = vld [vmem:[%s3041_s0 + $0x250] sm:$0xf0] }
 0x157   : > { %v949_v31 = vsel %vm948_vm9, %v944_v15, %v945_v23  ;;  %v2306_v15 = vld [vmem:[%s3041_s0 + $0xb8] sm:$0xf0] }
 0x158   : > { %v951_v33 = vsel %vm950_vm3, %v947_v29, %v949_v31  ;;  %1575 = vmatpush.bf16.msrb.mxu3 %v1975_v28  ;;  %1588 = vmatpush.bf16.msrb.mxu0 %v2071_v32  ;;  %v2063_v21 = vor.u32 %v2306_v15, %v2062_v11  ;;  %v2303_v28 = vld [vmem:[%s3041_s0 + $0xa0] sm:$0xf0]  ;;  %v2146_v29 = vld [vmem:[%s3041_s0 + $0x158] sm:$0xf] }
 0x159   : > { %v953_v40 = vmul.f32 %v951_v33, %v894_v51  ;;  %1614 = vmatpush.bf16.msrb.mxu2 %v2263_v24  ;;  %v2050_v51 = vld [vmem:[%s3041_s0 + $0x98] sm:$0xf]  ;;  %v2327_v31 = vld [vmem:[%s3041_s0 + $0x160] sm:$0xf0] }
 0x15a   : > { %1598 = vmatpush.bf16.msrb.mxu1 %v2203_v34  ;;  %v2242_v33 = vld [vmem:[%s3041_s0 + $0x218] sm:$0xf]  ;;  %v2351_v34 = vld [vmem:[%s3041_s0 + $0x220] sm:$0xf0]  ;;  %v2147_v41 = vor.u32 %v2327_v31, %v2146_v29 }
 0x15b   : > { %v956_v30 = vperm.slane %v953_v40, 0  ;;  %v957_v44 = vperm.slane %v953_v40, 1  ;;  %v958_v45 = vperm.slane %v953_v40, 2  ;;  %v959_v46 = vperm.slane %v953_v40, 3  ;;  %v2194_v11 = vld [vmem:[%s3041_s0 + $0x1b8] sm:$0xf] }
 0x15c   : > { %v2051_v40 = vor.u32 %v2303_v28, %v2050_v51  ;;  %v2170_v51 = vld [vmem:[%s3041_s0 + $0x188] sm:$0xf] }
 0x15d   : > { %v965_v48 = vmul.f32 %v957_v44, %v3093_v4  ;;  %v966_v49 = vmul.f32 %v958_v45, %v3110_v43  ;;  %v967_v50 = vmul.f32 %v959_v46, %v3125_v57  ;;  %v964_v54 = vmul.f32 %v956_v30, %v3090_v2 }
 0x15e   : > { %1599 = vmatpush.bf16.msrb.mxu1 %v2191_v47  ;;  %v2167_v2 = vor.u32 %v2331_v25, %v2164_v61  ;;  %v983_v63 = vmul.f32 %v959_v46, %v3078_v38  ;;  %v980_v0 = vmul.f32 %v956_v30, %v3053_v8  ;;  %v981_v1 = vmul.f32 %v957_v44, %v3055_v9  ;;  %v2158_v8 = vld [vmem:[%s3041_s0 + $0x170] sm:$0xf]  ;;  %v2300_v44 = vld [vmem:[%s3041_s0 + $0x88] sm:$0xf0]  ;;  %v2230_v47 = vld [vmem:[%s3041_s0 + $0x200] sm:$0xf] }
 0x15f   : > { %v972_v55 = vrot.slane %v965_v48, 7  ;;  %v973_v56 = vrot.slane %v966_v49, 6  ;;  %v974_v58 = vrot.slane %v967_v50, 5  ;;  %v982_v3 = vmul.f32 %v958_v45, %v3076_v37  ;;  %v2254_v9 = vld [vmem:[%s3041_s0 + $0x230] sm:$0xf] }
 0x160   : > { %v2266_v37 = vld [vmem:[%s3041_s0 + $0x248] sm:$0xf]  ;;  %v2159_v22 = vor.u32 %v2330_v16, %v2158_v8  ;;  %v2255_v36 = vor.u32 %v2354_v5, %v2254_v9  ;;  %v2243_v30 = vor.u32 %v2351_v34, %v2242_v33  ;;  %v2134_v45 = vld [vmem:[%s3041_s0 + $0x140] sm:$0xf]  ;;  %v2324_v46 = vld [vmem:[%s3041_s0 + $0x148] sm:$0xf0]  ;;  %v2039_v49 = vor.u32 %v2300_v44, %v2038_v42 }
 0x161   : > { %v975_v4 = vsel %vm946_vm8, %v964_v54, %v972_v55  ;;  %v976_v43 = vsel %vm948_vm9, %v973_v56, %v974_v58  ;;  %v2267_v32 = vor.u32 %v2357_v20, %v2266_v37  ;;  %v2348_v48 = vld [vmem:[%s3041_s0 + $0x208] sm:$0xf0]  ;;  %v2135_v50 = vor.u32 %v2324_v46, %v2134_v45  ;;  %v2297_v54 = vld [vmem:[%s3041_s0 + $0x70] sm:$0xf0]  ;;  %v2122_v55 = vld [vmem:[%s3041_s0 + $0x128] sm:$0xf] }
 0x162   : > { %v977_v57 = vsel %vm950_vm3, %v975_v4, %v976_v43  ;;  %1600 = vmatpush.bf16.msrb.mxu1 %v2179_v60  ;;  %v2231_v52 = vor.u32 %v2348_v48, %v2230_v47  ;;  %v2321_v56 = vld [vmem:[%s3041_s0 + $0x130] sm:$0xf0]  ;;  %v2218_v58 = vld [vmem:[%s3041_s0 + $0x1e8] sm:$0xf]  ;;  %v2027_v60 = vor.u32 %v2297_v54, %v2026_v53  ;;  %v2014_v61 = vld [vmem:[%s3041_s0 + $0x50] sm:$0xf] }
 0x163   : > { %v979_v62 = vsub.f32 %v954_v59, %v977_v57  ;;  %v2345_v59 = vld [vmem:[%s3041_s0 + $0x1f0] sm:$0xf0]  ;;  %v2123_v25 = vor.u32 %v2321_v56, %v2122_v55  ;;  %v2294_v43 = vld [vmem:[%s3041_s0 + $0x58] sm:$0xf0]  ;;  %v2110_v57 = vld [vmem:[%s3041_s0 + $0x110] sm:$0xf] }
 0x164   : > { %v2219_v4 = vor.u32 %v2345_v59, %v2218_v58  ;;  %v2288_v8 = vld [vmem:[%s3041_s0 + $0x28] sm:$0xf0]  ;;  %v2086_v16 = vld [vmem:[%s3041_s0 + $0xe0] sm:$0xf]  ;;  %v2285_v20 = vld [vmem:[%s3041_s0 + $0x10] sm:$0xf0] }
 0x165   : > { %v988_v6 = vperm.slane %v979_v62, 3  ;;  %v985_v35 = vperm.slane %v979_v62, 0  ;;  %v986_v7 = vperm.slane %v979_v62, 1  ;;  %v987_v10 = vperm.slane %v979_v62, 2  ;;  %v2318_v62 = vld [vmem:[%s3041_s0 + $0x118] sm:$0xf0] }
 0x166   : > { %1601 = vmatpush.bf16.msrb.mxu1 %v2167_v2  ;;  %v2206_v2 = vld [vmem:[%s3041_s0 + $0x1d0] sm:$0xf]  ;;  %v2312_v9 = vld [vmem:[%s3041_s0 + $0xe8] sm:$0xf0]  ;;  %v2182_v5 = vld [vmem:[%s3041_s0 + $0x1a0] sm:$0xf] }
 0x167   : > { %v996_v12 = vadd.f32 %v988_v6, %v983_v63  ;;  %v993_v13 = vadd.f32 %v985_v35, %v980_v0  ;;  %v994_v38 = vadd.f32 %v986_v7, %v981_v1  ;;  %v995_v14 = vadd.f32 %v987_v10, %v982_v3  ;;  %v2342_v63 = vld [vmem:[%s3041_s0 + $0x1d8] sm:$0xf0]  ;;  %v2002_v3 = vld [vmem:[%s3041_s0 + $0x38] sm:$0xf]  ;;  %v2291_v35 = vld [vmem:[%s3041_s0 + $0x40] sm:$0xf0] }
 0x168   : > { %v2015_v0 = vor.u32 %v2294_v43, %v2014_v61  ;;  %v2111_v1 = vor.u32 %v2318_v62, %v2110_v57  ;;  %v2207_v6 = vor.u32 %v2342_v63, %v2206_v2  ;;  %v2098_v7 = vld [vmem:[%s3041_s0 + $0xf8] sm:$0xf]  ;;  %v2315_v10 = vld [vmem:[%s3041_s0 + $0x100] sm:$0xf0]  ;;  %v2336_v37 = vld [vmem:[%s3041_s0 + $0x1a8] sm:$0xf0] }
 0x169   : > { %v1000_v17 = vmax.f32 %v996_v12, 0.0  ;;  %v997_v39 = vmax.f32 %v993_v13, 0.0  ;;  %v998_v18 = vmax.f32 %v994_v38, 0.0  ;;  %v999_v19 = vmax.f32 %v995_v14, 0.0  ;;  %v2339_v12 = vld [vmem:[%s3041_s0 + $0x1c0] sm:$0xf0] }
 0x16a   : > { %v2003_v13 = vor.u32 %v2291_v35, %v2002_v3  ;;  %v2099_v38 = vor.u32 %v2315_v10, %v2098_v7  ;;  %v1990_v14 = vld [vmem:[%s3041_s0 + $0x20] sm:$0xf]  ;;  %v2195_v15 = vor.u32 %v2339_v12, %v2194_v11 }
 0x16b   : > { %v3299_v23 = vpack.c.bf16 %v1000_v17, %v1000_v17  ;;  %v3301_v24 = vpack.c.bf16 %v997_v39, %v997_v39  ;;  %v3303_v26 = vpack.c.bf16 %v998_v18, %v998_v18  ;;  %v3305_v27 = vpack.c.bf16 %v999_v19, %v999_v19  ;;  %v1978_v18 = vld [vmem:[%s3041_s0 + $0x8] sm:$0xf] }
 0x16c   : > { %v1991_v17 = vor.u32 %v2288_v8, %v1990_v14  ;;  %v2087_v39 = vor.u32 %v2312_v9, %v2086_v16  ;;  %v2183_v19 = vor.u32 %v2336_v37, %v2182_v5  ;;  %v1979_v28 = vor.u32 %v2285_v20, %v1978_v18 }
 0x16d   : > { %1524 = vmatmul.bf16.vlgmr.msra.gmra.mxu0 %v3301_v24  ;;  %1537 = vmatmul.bf16.vlgmr.msra.gmra.mxu1 %v3303_v26 }
 0x16e   : > { %1550 = vmatmul.bf16.vlgmr.msra.gmra.mxu2 %v3305_v27  ;;  %2268 = vmatmul.msk.bf16.vlgmr.msra.gmra.mxu3 %vm830_vm4, %v3299_v23 }
 0x16f   : > { %1620 = vmatpush.bf16.msra.mxu2 %v2063_v21  ;;  %1633 = vmatpush.bf16.msra.mxu3 %v2159_v22  ;;  %v2074_v21 = vld [vmem:[%s3041_s0 + $0xc8] sm:$0xf]  ;;  %v2309_v22 = vld [vmem:[%s3041_s0 + $0xd0] sm:$0xf0] }
 0x170   : > { %1646 = vmatpush.bf16.msra.mxu0 %v2255_v36  ;;  %1666 = vmatpush.bf16.msra.mxu1 %v2267_v32  ;;  %v2333_v36 = vld [vmem:[%s3041_s0 + $0x190] sm:$0xf0]  ;;  %v2075_v29 = vor.u32 %v2309_v22, %v2074_v21 }
 0x171   : > { %v2171_v31 = vor.u32 %v2333_v36, %v2170_v51 }
 0x173   : > { %1621 = vmatpush.bf16.msra.mxu2 %v2051_v40  ;;  %1634 = vmatpush.bf16.msra.mxu3 %v2147_v41 }
 0x174   : > { %1647 = vmatpush.bf16.msra.mxu0 %v2243_v30  ;;  %v1105_v30 = vld [vmem:[%s614_s30] sm:$0x7] }
 0x175   : > { %v1108_v44 = vperm.slane %v1105_v30, 1 }
 0x177   : > { %1622 = vmatpush.bf16.msra.mxu2 %v2039_v49  ;;  %1635 = vmatpush.bf16.msra.mxu3 %v2135_v50  ;;  %v1107_v49 = vperm.slane %v1105_v30, 0 }
 0x178   : > { %1648 = vmatpush.bf16.msra.mxu0 %v2231_v52 }
 0x17b   : > { %1623 = vmatpush.bf16.msra.mxu2 %v2027_v60  ;;  %1636 = vmatpush.bf16.msra.mxu3 %v2123_v25  ;;  %v1109_v25 = vperm.slane %v1105_v30, 2 }
 0x17c   : > { %1649 = vmatpush.bf16.msra.mxu0 %v2219_v4 }
 0x17d   : > { %1589 = vmatmul.bf16.vlgmr.msrb.gmra.mxu0 %v3303_v26  ;;  %1602 = vmatmul.bf16.vlgmr.msrb.gmra.mxu1 %v3305_v27 }
 0x17e   : > { %1576 = vmatmul.bf16.vlgmr.msrb.gmra.mxu3 %v3301_v24  ;;  %2269 = vmatmul.msk.bf16.vlgmr.msrb.gmra.mxu2 %vm830_vm4, %v3299_v23 }
 0x17f   : > { %1624 = vmatpush.bf16.msra.mxu2 %v2015_v0  ;;  %1637 = vmatpush.bf16.msra.mxu3 %v2111_v1  ;;  %v1675_v0 = vld [vmem:[%s542_s20] sm:$0x7] }
 0x180   : > { %1650 = vmatpush.bf16.msra.mxu0 %v2207_v6  ;;  %v1678_v35 = vperm.slane %v1675_v0, 1  ;;  %v1677_v11 = vperm.slane %v1675_v0, 0 }
 0x183   : > { %1625 = vmatpush.bf16.msra.mxu2 %v2003_v13  ;;  %1638 = vmatpush.bf16.msra.mxu3 %v2099_v38  ;;  %v1679_v13 = vperm.slane %v1675_v0, 2 }
 0x184   : > { %1651 = vmatpush.bf16.msra.mxu0 %v2195_v15 }
 0x187   : > { %1626 = vmatpush.bf16.msra.mxu2 %v1991_v17  ;;  %1639 = vmatpush.bf16.msra.mxu3 %v2087_v39  ;;  %v2455_v39 = vld [vmem:[%s617_s9] ss:$0 sm:$0xff] }
 0x188   : > { %1652 = vmatpush.bf16.msra.mxu0 %v2183_v19 }
 0x18b   : > { %1627 = vmatpush.bf16.msra.mxu2 %v1979_v28  ;;  %1640 = vmatpush.bf16.msra.mxu3 %v2075_v29 }
 0x18c   : > { %1653 = vmatpush.bf16.msra.mxu0 %v2171_v31 }
 0x18d   : > { %2270 = vmatmul.msk.bf16.vlgmr.msra.gmra.mxu1 %vm830_vm4, %v3299_v23  ;;  %vm1687_vm4 = vcmask 359424  }
 0x18e   : > { %1628 = vmatmul.bf16.vlgmr.msra.gmra.mxu2 %v3301_v24  ;;  %1641 = vmatmul.bf16.vlgmr.msra.gmra.mxu3 %v3303_v26 }
 0x18f   : > { %1654 = vmatmul.bf16.vlgmr.msra.gmra.mxu0 %v3305_v27 }
 0x1ea   : > { %v1525_v32 = vpop.f32.mrf.mxu0  ;;  %v1538_v33 = vpop.f32.mrf.mxu1 }
 0x1eb   : > { %v1526_v53 = vadd.f32 %v1525_v32, %v1107_v49 }
 0x1ed   : > { %v1539_v59 = vadd.f32 %v1538_v33, %v1526_v53 }
 0x1f1   : > { %v1551_v34 = vpop.f32.mrf.mxu2  ;;  %v1564_v40 = vpop.f32.mrf.mxu3 }
 0x1f2   : > { %v1527_v23 = vpop.f32.mrf.mxu0  ;;  %v1540_v41 = vpop.f32.mrf.mxu1  ;;  %v1552_v61 = vadd.f32 %v1551_v34, %v1539_v59 }
 0x1f4   : > { %v1565_v63 = vadd.f32 %v1564_v40, %v1552_v61 }
 0x1f6   : > { %v1672_v10 = vmax.f32 %v1565_v63, 0.0 }
 0x1f8   : > { %v1683_v16 = vmul.f32 %v1677_v11, %v1672_v10 }
 0x1f9   : > { %v1553_v24 = vpop.f32.mrf.mxu2  ;;  %v1566_v26 = vpop.f32.mrf.mxu3 }
 0x1fa   : > { %v1590_v42 = vpop.f32.mrf.mxu0  ;;  %v1603_v27 = vpop.f32.mrf.mxu1 }
 0x201   : > { %v1577_v45 = vpop.f32.mrf.mxu3  ;;  %v1616_v46 = vpop.f32.mrf.mxu2 }
 0x202   : > { %v1592_v47 = vpop.f32.mrf.mxu0  ;;  %v1605_v48 = vpop.f32.mrf.mxu1  ;;  %v1578_v50 = vadd.f32 %v1577_v45, %v1108_v44 }
 0x204   : > { %v1591_v52 = vadd.f32 %v1590_v42, %v1578_v50 }
 0x206   : > { %v1604_v60 = vadd.f32 %v1603_v27, %v1591_v52 }
 0x208   : > { %v1617_v4 = vadd.f32 %v1616_v46, %v1604_v60 }
 0x209   : > { %v1579_v54 = vpop.f32.mrf.mxu3  ;;  %v1618_v55 = vpop.f32.mrf.mxu2 }
 0x20a   : > { %v1668_v56 = vpop.f32.mrf.mxu1  ;;  %v1673_v6 = vmax.f32 %v1617_v4, 0.0 }
 0x20c   : > { %v1655_v58 = vpop.f32.mrf.mxu0  ;;  %v1684_v38 = vmul.f32 %v1678_v35, %v1673_v6 }
 0x20e   : > { %v1686_v5 = vadd.f32 %v1684_v38, %v1683_v16 }
 0x211   : > { %v1629_v43 = vpop.f32.mrf.mxu2  ;;  %v1642_v57 = vpop.f32.mrf.mxu3 }
 0x212   : > { %v1630_v62 = vadd.f32 %v1629_v43, %v1109_v25  ;;  %v1670_v2 = vpop.f32.mrf.mxu1 }
 0x214   : > { %v1643_v1 = vadd.f32 %v1642_v57, %v1630_v62  ;;  %v1657_v3 = vpop.f32.mrf.mxu0 }
 0x216   : > { %v1656_v7 = vadd.f32 %v1655_v58, %v1643_v1 }
 0x218   : > { %v1669_v12 = vadd.f32 %v1668_v56, %v1656_v7 }
 0x219   : > { %v1631_v14 = vpop.f32.mrf.mxu2  ;;  %v1644_v15 = vpop.f32.mrf.mxu3 }
 0x21a   : > { %v1674_v8 = vmax.f32 %v1669_v12, 0.0 }
 0x21c   : > { %v1685_v9 = vmul.f32 %v1679_v13, %v1674_v8 }
 0x21e   : > { %v1688_v37 = vsel %vm1687_vm4, %v1685_v9, 0.0 }
 0x21f   : > { %v1689_v17 = vadd.f32 %v1688_v37, %v1686_v5 }
 0x221   : > { %1690 = vadd.xlane.f32.xlu0 %v1689_v17 }
 0x294   : > { %v1691_v18 = vpop.xlane.xlu0 %1690 }
 0x295   : > { %v1696_v19 = vadd.f32 %v2455_v39, %v1691_v18 }
 0x297   : > { %1698 = vst.msk [vmem:[%s621_s28] sm:$0xff] %vm1697_vm5, %v1696_v19 }
 0x298 PF: > { %s3442_s16 = sld [smem:[#allocation16_spill]]  ;;  %s3445_s13 = smov %s2740_s14 }
 0x299   : > { %s3443_s23 = sld [smem:[#allocation15_spill]] }
 0x29a   : > { %s3444_s15 = sld [smem:[#allocation17_spill]] }
 0x29e   : > { %p19_p8 = scmp.ge.s32.totalorder %s3442_s16, 4  }
 0x29f   : > { %s3446_s14 = smov %s3443_s23 }
 0x2a0   :  { %21 = sbr.rel (!%p19_p8) target bundleno = 10 (0xa), region = 168 }
 0x2a5   :  { %1718 = vsyncpa [#allocation3], 1 }
 0x2a6   :  { %1720 = vsyncpa [#allocation3 + $0x1], 1 }
 0x2a7   :  { %1721 = vsyncpa [#allocation5], 1 }

</bundles_post_ra>
